<compile_context>
chip_gen: v5e
topology: v5e:2x2
jax: 0.10.0
libtpu: 0.0.40
codegen_flags: <defaults>
</compile_context>

<pallas_src>
import jax
import jax.numpy as jnp
from jax import lax
from jax.experimental import pallas as pl
from jax.experimental.pallas import tpu as pltpu

KH = KW = 3
K = KH * KW  # 9 kernel taps


def _deform_sample_kernel(py_ref, px_ref, imgbd_ref, ygrid_ref, xgrid_ref,
                          w2e_ref, b2_ref, out_ref):
    """One batch element per grid step.

    py_ref    : (P, K*Hin)       f32  sample-row coord, lane-replicated over y
    px_ref    : (P, K*C*Win)     f32  sample-col coord, lane-replicated over (c, w)
    imgbd_ref : (K*Hin, K*C*Win) bf16 block-diagonal channel-stacked image
    ygrid_ref : (1, K*Hin)       f32  lane -> y index  (l % Hin)
    xgrid_ref : (1, K*C*Win)     f32  lane -> w index  (l % Win)
    w2e_ref   : (K*C*Win, Cout)  f32  deform-conv weight replicated over w
    b2_ref    : (1, Cout)        f32
    out_ref   : (P, Cout)        f32
    """
    # Separable bilinear weights; zero outside the image (matches torchvision).
    wy = jnp.maximum(0.0, 1.0 - jnp.abs(py_ref[...] - ygrid_ref[...]))   # (P, K*Hin)
    wx = jnp.maximum(0.0, 1.0 - jnp.abs(px_ref[...] - xgrid_ref[...]))   # (P, K*C*Win)

    # (1) Bilinear row-gather for all channels and all K taps in one matmul:
    #     t[p, k*C*Win + c*Win + w] = sum_y wy[p, k, y] * x[c, y, w]
    t = jnp.dot(wy.astype(jnp.bfloat16), imgbd_ref[...],
                preferred_element_type=jnp.float32)                      # (P, K*C*Win)

    # (2) Fold the wx multiply + w-reduction + (c, k) contraction with the
    #     deformable-conv weight into one wide-contraction matmul (f32 for
    #     accuracy; the tile is tiny so MXU cost is negligible).
    v = t * wx
    out_ref[...] = jnp.dot(v, w2e_ref[...],
                           preferred_element_type=jnp.float32) + b2_ref[...]


def deform_model_forward(x, w1, b1, w2, b2):
    """x: (B, 3, H, W) float32 NCHW.  Returns (B, 3, H-2, W-2) NCHW."""
    B, C, Hin, Win = x.shape
    Ho, Wo = Hin - KH + 1, Win - KW + 1
    P = Ho * Wo
    Cout = w2.shape[0]
    CW = C * Win
    KHIN = K * Hin
    KCW = K * CW

    # ---- conv1 offsets via plain XLA -------------------------------------
    off = lax.conv_general_dilated(
        x, w1, window_strides=(1, 1), padding='VALID',
        dimension_numbers=('NCHW', 'OIHW', 'NCHW')) + b1[None, :, None, None]
    dy = off[:, 0::2]                                    # (B, K, Ho, Wo)  h-offsets (even chans)
    dx = off[:, 1::2]                                    # (B, K, Ho, Wo)  w-offsets (odd chans)

    ik = jnp.repeat(jnp.arange(KH, dtype=jnp.float32), KW)   # tap row i(k)
    jk = jnp.tile(jnp.arange(KW, dtype=jnp.float32), KH)     # tap col j(k)
    py = (jnp.arange(Ho, dtype=jnp.float32)[None, None, :, None]
          + ik[None, :, None, None] + dy)                # (B, K, Ho, Wo)
    px = (jnp.arange(Wo, dtype=jnp.float32)[None, None, None, :]
          + jk[None, :, None, None] + dx)

    # Lane-replicated coordinate slabs consumed by the kernel (built once in
    # XLA; total HBM traffic at these shapes is well under 1 MiB).
    py_pk = py.transpose(0, 2, 3, 1).reshape(B, P, K)
    px_pk = px.transpose(0, 2, 3, 1).reshape(B, P, K)
    py_rep = jnp.repeat(py_pk, Hin, axis=-1)             # (B, P, K*Hin)
    px_rep = jnp.repeat(px_pk, CW, axis=-1)              # (B, P, K*C*Win)

    # Block-diagonal channel-stacked image:
    #   imgbd[b, k*Hin + y, k*C*Win + c*Win + w] = x[b, c, y, w]
    img_cl = x.transpose(0, 2, 1, 3).reshape(B, Hin, CW)     # (B, Hin, C*Win)
    eyek = jnp.eye(K, dtype=x.dtype)
    imgbd = jnp.einsum('kl,byc->bkylc', eyek, img_cl).reshape(B, KHIN, KCW)
    imgbd_bf = imgbd.astype(jnp.bfloat16)                # bf16 MXU input, f32 accumulation

    # Lane -> (y, w) index grids for the in-kernel bilinear weights.
    ygrid = jnp.tile(jnp.arange(Hin, dtype=jnp.float32), K).reshape(1, KHIN)
    xgrid = jnp.tile(jnp.arange(Win, dtype=jnp.float32), K * C).reshape(1, KCW)

    # Deform-conv weight replicated over w:  W2exp[(k, c, w), o] = w2[o, c, k]
    w2_kco = jnp.transpose(w2.reshape(Cout, C, K), (2, 1, 0))           # (K, C, Cout)
    w2e = jnp.broadcast_to(w2_kco[:, :, None, :],
                           (K, C, Win, Cout)).reshape(KCW, Cout)
    b2m = b2.reshape(1, Cout)

    flops = 2 * B * (P * KHIN * KCW + P * KCW * Cout)
    bytes_accessed = 4 * (B * P * (KHIN + KCW)          # py_rep, px_rep
                          + KCW * Cout + Cout           # w2e, b2
                          + KHIN + KCW                  # ygrid, xgrid
                          + B * P * Cout) \
        + 2 * B * KHIN * KCW                            # imgbd (bf16)

    out_flat = pl.pallas_call(
        _deform_sample_kernel,
        out_shape=jax.ShapeDtypeStruct((B, P, Cout), jnp.float32),
        grid=(B,),
        in_specs=[
            pl.BlockSpec((None, P, KHIN), lambda b: (b, 0, 0)),   # py_rep
            pl.BlockSpec((None, P, KCW), lambda b: (b, 0, 0)),    # px_rep
            pl.BlockSpec((None, KHIN, KCW), lambda b: (b, 0, 0)), # imgbd (bf16)
            pl.BlockSpec((1, KHIN), lambda b: (0, 0)),            # ygrid (shared)
            pl.BlockSpec((1, KCW), lambda b: (0, 0)),             # xgrid (shared)
            pl.BlockSpec((KCW, Cout), lambda b: (0, 0)),          # W2exp (shared)
            pl.BlockSpec((1, Cout), lambda b: (0, 0)),            # bias  (shared)
        ],
        out_specs=pl.BlockSpec((None, P, Cout), lambda b: (b, 0, 0)),
        compiler_params=pltpu.CompilerParams(
            dimension_semantics=("parallel",),        # v7x: one batch element per TC
            vmem_limit_bytes=32 * 1024 * 1024,        # real footprint ~3 MiB
        ),
        cost_estimate=pl.CostEstimate(flops=flops, transcendentals=0,
                                      bytes_accessed=bytes_accessed),
    )(py_rep, px_rep, imgbd_bf, ygrid, xgrid, w2e, b2m)

    # TODO(synk): for larger B/H/W, add a pixel-tile grid axis over P so the
    # per-step py/px/wy/wx blocks stay a few MiB and pipeline via BlockSpec.

    # channels-last flat -> NCHW (output slab is only B*P*Cout*4 ~= 5 KB, so
    # the lane-sparse (P, Cout=3) store is immaterial; transpose stays in XLA).
    return out_flat.reshape(B, Ho, Wo, Cout).transpose(0, 3, 1, 2)


def reference_forward(x, w1, b1, w2, b2):
    """Pure-JAX reference of conv1 + torchvision-style deform_conv2d."""
    B, C, Hin, Win = x.shape
    Ho, Wo = Hin - KH + 1, Win - KW + 1
    Cout = w2.shape[0]
    off = lax.conv_general_dilated(
        x, w1, window_strides=(1, 1), padding='VALID',
        dimension_numbers=('NCHW', 'OIHW', 'NCHW')) + b1[None, :, None, None]
    dy = off[:, 0::2]                                    # (B, K, Ho, Wo)
    dx = off[:, 1::2]
    ik = jnp.repeat(jnp.arange(KH, dtype=jnp.float32), KW)
    jk = jnp.tile(jnp.arange(KW, dtype=jnp.float32), KH)
    py = (jnp.arange(Ho, dtype=jnp.float32)[None, None, :, None]
          + ik[None, :, None, None] + dy)
    px = (jnp.arange(Wo, dtype=jnp.float32)[None, None, None, :]
          + jk[None, :, None, None] + dx)
    wy = jnp.maximum(0.0, 1.0 - jnp.abs(
        py[..., None] - jnp.arange(Hin, dtype=jnp.float32)))
    wx = jnp.maximum(0.0, 1.0 - jnp.abs(
        px[..., None] - jnp.arange(Win, dtype=jnp.float32)))
    sampled = jnp.einsum('bkhwy,bkhwx,bcyx->bckhw', wy, wx, x)
    out = jnp.einsum('ock,bckhw->bohw', w2.reshape(Cout, C, K), sampled)
    return out + b2[None, :, None, None]


if __name__ == "__main__":
    key = jax.random.PRNGKey(0)
    k1, k2, k3, k4, k5 = jax.random.split(key, 5)

    B, C, Hin, Win = 2, 3, 16, 16
    x = jax.random.normal(k5, (B, C, Hin, Win), dtype=jnp.float32)
    # conv1: 3->18 k3 with bias; deform conv: 3->3 k3 with bias
    w1 = 0.1 * jax.random.normal(k1, (2 * K, C, KH, KW), dtype=jnp.float32)
    b1 = 0.05 * jax.random.normal(k2, (2 * K,), dtype=jnp.float32)
    w2 = 0.2 * jax.random.normal(k3, (C, C, KH, KW), dtype=jnp.float32)
    b2 = 0.1 * jax.random.normal(k4, (C,), dtype=jnp.float32)

    out = deform_model_forward(x, w1, b1, w2, b2)
    out = jax.block_until_ready(out)

    assert out.shape == (B, C, Hin - 2, Win - 2), out.shape
    ref = reference_forward(x, w1, b1, w2, b2)
    max_err = float(jnp.max(jnp.abs(out - ref)))
    # bf16 is used only on the sampling-matmul inputs (f32 accumulation).
    assert max_err < 4e-2, f"max abs error vs reference: {max_err}"
    print("KERNEL_OK")
</pallas_src>

<mosaic_0001>
module attributes {stable_mosaic.version = 11 : i64} {
  func.func @_deform_sample_kernel(%arg0: i32, %arg1: memref<1x196x144xf32, #tpu.memory_space<vmem>>, %arg2: memref<1x196x432xf32, #tpu.memory_space<vmem>>, %arg3: memref<1x144x432xbf16, #tpu.memory_space<vmem>>, %arg4: memref<1x144xf32, #tpu.memory_space<vmem>>, %arg5: memref<1x432xf32, #tpu.memory_space<vmem>>, %arg6: memref<432x3xf32, #tpu.memory_space<vmem>>, %arg7: memref<1x3xf32, #tpu.memory_space<vmem>>, %arg8: memref<1x196x3xf32, #tpu.memory_space<vmem>>) attributes {dimension_semantics = [#tpu.dimension_semantics<parallel>], iteration_bounds = array<i64: 2>, scalar_prefetch = 0 : i64, scratch_operands = 0 : i64, tpu.core_type = #tpu.core_type<tc>, window_params = [{transform_indices = @transform_0, window_bounds = array<i64: 1, 196, 144>}, {transform_indices = @transform_1, window_bounds = array<i64: 1, 196, 432>}, {transform_indices = @transform_2, window_bounds = array<i64: 1, 144, 432>}, {pipeline_mode = #tpu.pipeline_mode<synchronous>, transform_indices = @transform_3, window_bounds = array<i64: 1, 144>}, {pipeline_mode = #tpu.pipeline_mode<synchronous>, transform_indices = @transform_4, window_bounds = array<i64: 1, 432>}, {pipeline_mode = #tpu.pipeline_mode<synchronous>, transform_indices = @transform_5, window_bounds = array<i64: 432, 3>}, {pipeline_mode = #tpu.pipeline_mode<synchronous>, transform_indices = @transform_6, window_bounds = array<i64: 1, 3>}, {transform_indices = @transform_7, window_bounds = array<i64: 1, 196, 3>}]} {
    %c0 = arith.constant 0 : index
    %c0_0 = arith.constant 0 : index
    %c0_1 = arith.constant 0 : index
    %0 = vector.load %arg1[%c0, %c0_0, %c0_1] : memref<1x196x144xf32, #tpu.memory_space<vmem>>, vector<1x196x144xf32>
    %1 = vector.shape_cast %0 : vector<1x196x144xf32> to vector<196x144xf32>
    %c0_2 = arith.constant 0 : index
    %c0_3 = arith.constant 0 : index
    %2 = vector.load %arg4[%c0_2, %c0_3] : memref<1x144xf32, #tpu.memory_space<vmem>>, vector<1x144xf32>
    %3 = vector.broadcast %2 : vector<1x144xf32> to vector<196x144xf32>
    %4 = arith.subf %1, %3 : vector<196x144xf32>
    %5 = math.absf %4 : vector<196x144xf32>
    %cst = arith.constant 1.000000e+00 : f32
    %6 = vector.broadcast %cst : f32 to vector<196x144xf32>
    %7 = arith.subf %6, %5 : vector<196x144xf32>
    %cst_4 = arith.constant 0.000000e+00 : f32
    %8 = vector.broadcast %cst_4 : f32 to vector<196x144xf32>
    %9 = arith.maximumf %8, %7 : vector<196x144xf32>
    %c0_5 = arith.constant 0 : index
    %c0_6 = arith.constant 0 : index
    %c0_7 = arith.constant 0 : index
    %10 = vector.load %arg2[%c0_5, %c0_6, %c0_7] : memref<1x196x432xf32, #tpu.memory_space<vmem>>, vector<1x196x432xf32>
    %11 = vector.shape_cast %10 : vector<1x196x432xf32> to vector<196x432xf32>
    %c0_8 = arith.constant 0 : index
    %c0_9 = arith.constant 0 : index
    %12 = vector.load %arg5[%c0_8, %c0_9] : memref<1x432xf32, #tpu.memory_space<vmem>>, vector<1x432xf32>
    %13 = vector.broadcast %12 : vector<1x432xf32> to vector<196x432xf32>
    %14 = arith.subf %11, %13 : vector<196x432xf32>
    %15 = math.absf %14 : vector<196x432xf32>
    %cst_10 = arith.constant 1.000000e+00 : f32
    %16 = vector.broadcast %cst_10 : f32 to vector<196x432xf32>
    %17 = arith.subf %16, %15 : vector<196x432xf32>
    %cst_11 = arith.constant 0.000000e+00 : f32
    %18 = vector.broadcast %cst_11 : f32 to vector<196x432xf32>
    %19 = arith.maximumf %18, %17 : vector<196x432xf32>
    %20 = arith.truncf %9 : vector<196x144xf32> to vector<196x144xbf16>
    %c0_12 = arith.constant 0 : index
    %c0_13 = arith.constant 0 : index
    %c0_14 = arith.constant 0 : index
    %21 = vector.load %arg3[%c0_12, %c0_13, %c0_14] : memref<1x144x432xbf16, #tpu.memory_space<vmem>>, vector<1x144x432xbf16>
    %22 = vector.shape_cast %21 : vector<1x144x432xbf16> to vector<144x432xbf16>
    %cst_15 = arith.constant dense<0.000000e+00> : vector<196x432xf32>
    %23 = tpu.matmul %20, %22, %cst_15 {dimension_numbers = #tpu.dot_dimension_numbers<[1], [0], [0], [1], [0, 0, 1, 1], [], []>} : vector<196x144xbf16>, vector<144x432xbf16>, vector<196x432xf32> -> vector<196x432xf32>
    %24 = arith.mulf %23, %19 : vector<196x432xf32>
    %c0_16 = arith.constant 0 : index
    %c0_17 = arith.constant 0 : index
    %25 = vector.load %arg6[%c0_16, %c0_17] : memref<432x3xf32, #tpu.memory_space<vmem>>, vector<432x3xf32>
    %cst_18 = arith.constant dense<0.000000e+00> : vector<196x3xf32>
    %26 = tpu.matmul %24, %25, %cst_18 {dimension_numbers = #tpu.dot_dimension_numbers<[1], [0], [0], [1], [0, 0, 1, 1], [], []>} : vector<196x432xf32>, vector<432x3xf32>, vector<196x3xf32> -> vector<196x3xf32>
    %c0_19 = arith.constant 0 : index
    %c0_20 = arith.constant 0 : index
    %27 = vector.load %arg7[%c0_19, %c0_20] : memref<1x3xf32, #tpu.memory_space<vmem>>, vector<1x3xf32>
    %28 = vector.broadcast %27 : vector<1x3xf32> to vector<196x3xf32>
    %29 = arith.addf %26, %28 : vector<196x3xf32>
    %c0_21 = arith.constant 0 : index
    %c0_22 = arith.constant 0 : index
    %c0_23 = arith.constant 0 : index
    %30 = vector.load %arg8[%c0_21, %c0_22, %c0_23] : memref<1x196x3xf32, #tpu.memory_space<vmem>>, vector<1x196x3xf32>
    %31 = vector.shape_cast %30 : vector<1x196x3xf32> to vector<196x3xf32>
    %32 = vector.shape_cast %29 : vector<196x3xf32> to vector<1x196x3xf32>
    tpu.vector_store %arg8[%c0_21, %c0_22, %c0_23], %32 {strides = array<i32>} : memref<1x196x3xf32, #tpu.memory_space<vmem>>, vector<1x196x3xf32>,
    return
  }
  func.func @transform_0(%arg0: i32) -> (i32, i32, i32) {
    %c0_i32 = arith.constant 0 : i32
    %c0_i32_0 = arith.constant 0 : i32
    %c0_i32_1 = arith.constant 0 : i32
    return %arg0, %c0_i32, %c0_i32_0 : i32, i32, i32
  }
  func.func @transform_1(%arg0: i32) -> (i32, i32, i32) {
    %c0_i32 = arith.constant 0 : i32
    %c0_i32_0 = arith.constant 0 : i32
    %c0_i32_1 = arith.constant 0 : i32
    return %arg0, %c0_i32, %c0_i32_0 : i32, i32, i32
  }
  func.func @transform_2(%arg0: i32) -> (i32, i32, i32) {
    %c0_i32 = arith.constant 0 : i32
    %c0_i32_0 = arith.constant 0 : i32
    %c0_i32_1 = arith.constant 0 : i32
    return %arg0, %c0_i32, %c0_i32_0 : i32, i32, i32
  }
  func.func @transform_3(%arg0: i32) -> (i32, i32) {
    %c0_i32 = arith.constant 0 : i32
    %c0_i32_0 = arith.constant 0 : i32
    %c0_i32_1 = arith.constant 0 : i32
    return %c0_i32, %c0_i32_0 : i32, i32
  }
  func.func @transform_4(%arg0: i32) -> (i32, i32) {
    %c0_i32 = arith.constant 0 : i32
    %c0_i32_0 = arith.constant 0 : i32
    %c0_i32_1 = arith.constant 0 : i32
    return %c0_i32, %c0_i32_0 : i32, i32
  }
  func.func @transform_5(%arg0: i32) -> (i32, i32) {
    %c0_i32 = arith.constant 0 : i32
    %c0_i32_0 = arith.constant 0 : i32
    %c0_i32_1 = arith.constant 0 : i32
    return %c0_i32, %c0_i32_0 : i32, i32
  }
  func.func @transform_6(%arg0: i32) -> (i32, i32) {
    %c0_i32 = arith.constant 0 : i32
    %c0_i32_0 = arith.constant 0 : i32
    %c0_i32_1 = arith.constant 0 : i32
    return %c0_i32, %c0_i32_0 : i32, i32
  }
  func.func @transform_7(%arg0: i32) -> (i32, i32, i32) {
    %c0_i32 = arith.constant 0 : i32
    %c0_i32_0 = arith.constant 0 : i32
    %c0_i32_1 = arith.constant 0 : i32
    return %arg0, %c0_i32, %c0_i32_0 : i32, i32, i32
  }
}

</mosaic_0001>

<bundles_post_ra>
// kernel: tpu_custom_call.1
= control target key start
LH: loop header
LB: loop body
LE: loop exit
PB: predicated region body
PF: predicated region fallthrough
CT: control target
= control target key end

     0   :  { %s3011_s24 = smov 0   ;;  %s4346_s0 = inlined_call_operand.vmem [shape: f32[2,196,144], index: 0, kind: input, shape index: {}]   ;;  %s4347_s1 = inlined_call_operand.vmem [shape: f32[2,196,432], index: 1, kind: input, shape index: {}]   ;;  %s4348_s2 = inlined_call_operand.vmem [shape: bf16[2,144,432], index: 2, kind: input, shape index: {}]   ;;  %s4349_s3 = inlined_call_operand.vmem [shape: f32[1,144], index: 3, kind: input, shape index: {}]   ;;  %s4350_s4 = inlined_call_operand.vmem [shape: f32[1,432], index: 4, kind: input, shape index: {}]   ;;  %s4351_s5 = inlined_call_operand.vmem [shape: f32[432,3], index: 5, kind: input, shape index: {}]   ;;  %s4352_s6 = inlined_call_operand.vmem [shape: f32[1,3], index: 6, kind: input, shape index: {}]   ;;  %s4353_s7 = inlined_call_operand.vmem [shape: f32[2,196,3], index: 7, kind: output, shape index: {}]  }
   0x1 LB: > { %s2660_s25 = sadd.s32 4294967295, %s2969_s24   ;;  %p2664_p0 = scmp.ge.s32.totalorder %s2969_s24, 1  ;;  %s2969_s24 = sphi %s3011_s24, %s17_s24  }
   0x2   : > { %p257_p1 = scmp.lt.s32.totalorder %s2969_s24, 3 }
   0x4   : > { %p258_p2 = pnand %p2664_p0, %p257_p1 }
   0x6   : > { %261 = sbr.rel (%p258_p2) target bundleno = 788 (0x314), region = 48 }
   0xb   : > { %p299_p3 = scmp.lt.s32.totalorder %s2660_s25, 1  ;;  %v370_v0 = vld [vmem:[%s4349_s3] sm:$0x3]  ;;  %vm1328_vm0 = vcmask 130048   ;;  %vm2110_vm1 = vcmask 392192   ;;  %vm2554_vm2 = vcmask 23552  }
   0xc   : > { %v3031_v1 = vperm.slane %v370_v0, 1  ;;  %v3064_v40 = vperm.slane %v370_v0, 0  ;;  %vm2579_vm3 = vcmask 19456  }
   0xd   : > { %s4421_s25 = smov (!%p299_p3, %s2660_s25), 1 }
   0xe   : > { %s2952_s28 = smul.u32 288, %s4421_s25 }
   0xf   : > { %s2950_s29 = smul.u32 400, %s4421_s25 }
  0x10   : > { %s3029_s9 = scalar_lea.vmem %s4348_s2, %s2952_s28  ;;  %s2951_s14 = smul.u32 800, %s4421_s25 }
  0x11   : > { %v2783_v2 = vld [vmem:[%s3029_s9 + $0xe0] sm:$0xf]  ;;  %v2922_v3 = vld [vmem:[%s3029_s9 + $0xec] sm:$0xf0]  ;;  %v2920_v4 = vld [vmem:[%s3029_s9 + $0xe4] sm:$0xf]  ;;  %s3042_s12 = scalar_lea.vmem %s4346_s0, %s2950_s29 }
  0x12   : > { %v2784_v5 = vor.u32 %v2922_v3, %v2783_v2  ;;  %v2785_v6 = vld [vmem:[%s3029_s9 + $0xf0] sm:$0xf0]  ;;  %v2767_v7 = vld [vmem:[%s3029_s9 + $0xc0] sm:$0xf]  ;;  %v2918_v8 = vld [vmem:[%s3029_s9 + $0xcc] sm:$0xf0]  ;;  %s3770_s19 = scalar_lea.vmem %s4347_s1, %s2951_s14 }
  0x13   : > { %v2788_v9 = vor.u32 %v2920_v4, %v2785_v6  ;;  %v2916_v10 = vld [vmem:[%s3029_s9 + $0xc4] sm:$0xf]  ;;  %v2769_v11 = vld [vmem:[%s3029_s9 + $0xd0] sm:$0xf0]  ;;  %v2799_v12 = vld [vmem:[%s3029_s9 + $0x100] sm:$0xf]  ;;  %v2768_v13 = vor.u32 %v2918_v8, %v2767_v7 }
  0x14   : > { %1368 = vmatpush.bf16.msra.mxu0 %v2784_v5  ;;  %v2926_v14 = vld [vmem:[%s3029_s9 + $0x10c] sm:$0xf0]  ;;  %v2924_v15 = vld [vmem:[%s3029_s9 + $0x104] sm:$0xf]  ;;  %v2801_v16 = vld [vmem:[%s3029_s9 + $0x110] sm:$0xf0]  ;;  %v2772_v17 = vor.u32 %v2916_v10, %v2769_v11 }
  0x15   : > { %1514 = vmatpush.bf16.msra.mxu2 %v2788_v9  ;;  %v2800_v18 = vor.u32 %v2926_v14, %v2799_v12  ;;  %v2804_v19 = vor.u32 %v2924_v15, %v2801_v16  ;;  %v2751_v20 = vld [vmem:[%s3029_s9 + $0xa0] sm:$0xf]  ;;  %v2914_v21 = vld [vmem:[%s3029_s9 + $0xac] sm:$0xf0]  ;;  %v321_v22 = vld [vmem:[%s3042_s12 + $0x8] sm:$0xff]  ;;  %s2953_s26 = smul.u32 200, %s4421_s25 }
  0x16   : > { %v323_v23 = vld [vmem:[%s3042_s12 + $0x18] sm:$0xff]  ;;  %v377_v24 = vsub.f32 %v321_v22, %v3031_v1  ;;  %v2912_v25 = vld [vmem:[%s3029_s9 + $0xa4] sm:$0xf]  ;;  %v2753_v26 = vld [vmem:[%s3029_s9 + $0xb0] sm:$0xf0]  ;;  %v2752_v28 = vor.u32 %v2914_v21, %v2751_v20 }
  0x17   : > { %1448 = vmatpush.bf16.msra.mxu1 %v2800_v18  ;;  %1594 = vmatpush.bf16.msra.mxu3 %v2804_v19  ;;  %v379_v27 = vsub.f32 %v323_v23, %v3031_v1  ;;  %v2735_v30 = vld [vmem:[%s3029_s9 + $0x80] sm:$0xf]  ;;  %v2807_v31 = vld [vmem:[%s3029_s9 + $0x108] sm:$0xf]  ;;  %v2756_v33 = vor.u32 %v2912_v25, %v2753_v26  ;;  %v2910_v34 = vld [vmem:[%s3029_s9 + $0x8c] sm:$0xf0]  ;;  %s4170_s28 = scalar_lea.vmem %s4353_s7, %s2953_s26 }
  0x18   : > { %1369 = vmatpush.bf16.msra.mxu0 %v2768_v13  ;;  %v427_v29 = vand.u32 2147483647, %v377_v24  ;;  %v2927_v35 = vld [vmem:[%s3029_s9 + $0x114] sm:$0xf0]  ;;  %v2908_v37 = vld [vmem:[%s3029_s9 + $0x84] sm:$0xf]  ;;  %v2736_v46 = vor.u32 %v2910_v34, %v2735_v30 }
  0x19   : > { %1515 = vmatpush.bf16.msra.mxu2 %v2772_v17  ;;  %v429_v32 = vand.u32 2147483647, %v379_v27  ;;  %v2808_v38 = vor.u32 %v2927_v35, %v2807_v31  ;;  %v325_v39 = vld [vmem:[%s3042_s12 + $0x28] sm:$0xff]  ;;  %v2737_v42 = vld [vmem:[%s3029_s9 + $0x90] sm:$0xf0]  ;;  %v327_v44 = vld [vmem:[%s3042_s12 + $0x38] sm:$0xff] }
  0x1a   : > { %v477_v36 = vsub.f32 1.0, %v427_v29  ;;  %v2791_v43 = vld [vmem:[%s3029_s9 + $0xe8] sm:$0xf]  ;;  %v2923_v47 = vld [vmem:[%s3029_s9 + $0xf4] sm:$0xf0]  ;;  %v320_v48 = vld [vmem:[%s3042_s12] sm:$0xff]  ;;  %v381_v53 = vsub.f32 %v325_v39, %v3031_v1  ;;  %v383_v54 = vsub.f32 %v327_v44, %v3031_v1  ;;  %v2740_v56 = vor.u32 %v2908_v37, %v2737_v42 }
  0x1b   : > { %v479_v41 = vsub.f32 1.0, %v429_v32  ;;  %1740 = vmatpush.bf16.msrb.mxu3 %v2808_v38  ;;  %v2719_v50 = vld [vmem:[%s3029_s9 + $0x60] sm:$0xf]  ;;  %v2906_v51 = vld [vmem:[%s3029_s9 + $0x6c] sm:$0xf0]  ;;  %v2792_v52 = vor.u32 %v2923_v47, %v2791_v43  ;;  %v376_v60 = vsub.f32 %v320_v48, %v3064_v40  ;;  %v331_v32 = vld [vmem:[%s3042_s12 + $0x58] sm:$0xff] }
  0x1c   : > { %1370 = vmatpush.bf16.msra.mxu0 %v2752_v28  ;;  %v527_v45 = vmax.f32 %v477_v36, 0.0  ;;  %v322_v55 = vld [vmem:[%s3042_s12 + $0x10] sm:$0xff]  ;;  %v2904_v58 = vld [vmem:[%s3029_s9 + $0x64] sm:$0xf]  ;;  %v2720_v62 = vor.u32 %v2906_v51, %v2719_v50  ;;  %v2703_v63 = vld [vmem:[%s3029_s9 + $0x40] sm:$0xf]  ;;  %v387_v44 = vsub.f32 %v331_v32, %v3031_v1 }
  0x1d   : > { %v529_v49 = vmax.f32 %v479_v41, 0.0  ;;  %1516 = vmatpush.bf16.msra.mxu2 %v2756_v33  ;;  %v2721_v59 = vld [vmem:[%s3029_s9 + $0x70] sm:$0xf0]  ;;  %1660 = vmatpush.bf16.msrb.mxu1 %v2792_v52  ;;  %v378_v61 = vsub.f32 %v322_v55, %v3064_v40  ;;  %v2902_v0 = vld [vmem:[%s3029_s9 + $0x4c] sm:$0xf0]  ;;  %v329_v28 = vld [vmem:[%s3042_s12 + $0x48] sm:$0xff] }
  0x1e   : > { %v431_v2 = vand.u32 2147483647, %v381_v53  ;;  %v433_v3 = vand.u32 2147483647, %v383_v54  ;;  %v2724_v4 = vor.u32 %v2904_v58, %v2721_v59  ;;  %v2900_v5 = vld [vmem:[%s3029_s9 + $0x44] sm:$0xf]  ;;  %v2704_v9 = vor.u32 %v2902_v0, %v2703_v63 }
  0x1f   : > { %v3076_v57 = vpack.c.bf16 %v529_v49, %v527_v45  ;;  %v2705_v6 = vld [vmem:[%s3029_s9 + $0x50] sm:$0xf0]  ;;  %v426_v7 = vand.u32 2147483647, %v376_v60  ;;  %v428_v8 = vand.u32 2147483647, %v378_v61  ;;  %v385_v39 = vsub.f32 %v329_v28, %v3031_v1 }
  0x20   : > { %1371 = vmatpush.bf16.msra.mxu0 %v2736_v46  ;;  %v2687_v10 = vld [vmem:[%s3029_s9 + $0x20] sm:$0xf]  ;;  %v2898_v11 = vld [vmem:[%s3029_s9 + $0x2c] sm:$0xf0]  ;;  %v481_v12 = vsub.f32 1.0, %v431_v2  ;;  %v483_v13 = vsub.f32 1.0, %v433_v3  ;;  %v2708_v14 = vor.u32 %v2900_v5, %v2705_v6 }
  0x21   : > { %2813 = vmatmul.msk.bf16.vlgmr.msra.gmra.mxu1 %vm1328_vm0, %v3076_v57  ;;  %2826 = vmatmul.msk.bf16.vlgmr.msra.gmra.mxu3 %vm1328_vm0, %v3076_v57  ;;  %v2775_v15 = vld [vmem:[%s3029_s9 + $0xc8] sm:$0xf]  ;;  %v2919_v16 = vld [vmem:[%s3029_s9 + $0xd4] sm:$0xf0]  ;;  %v2896_v17 = vld [vmem:[%s3029_s9 + $0x24] sm:$0xf]  ;;  %v2688_v22 = vor.u32 %v2898_v11, %v2687_v10 }
  0x22   : > { %1517 = vmatpush.bf16.msra.mxu2 %v2740_v56  ;;  %v2689_v18 = vld [vmem:[%s3029_s9 + $0x30] sm:$0xf0]  ;;  %v476_v19 = vsub.f32 1.0, %v426_v7  ;;  %v478_v20 = vsub.f32 1.0, %v428_v8  ;;  %v2776_v21 = vor.u32 %v2919_v16, %v2775_v15  ;;  %v2671_v23 = vld [vmem:[%s3029_s9] sm:$0xf] }
  0x23   : > { %v2894_v24 = vld [vmem:[%s3029_s9 + $0xc] sm:$0xf0]  ;;  %v531_v25 = vmax.f32 %v481_v12, 0.0  ;;  %v533_v26 = vmax.f32 %v483_v13, 0.0  ;;  %v2892_v27 = vld [vmem:[%s3029_s9 + $0x4] sm:$0xf]  ;;  %v2692_v29 = vor.u32 %v2896_v17, %v2689_v18 }
  0x24   : > { %1372 = vmatpush.bf16.msra.mxu0 %v2720_v62  ;;  %1661 = vmatpush.bf16.msrb.mxu1 %v2776_v21  ;;  %v2673_v30 = vld [vmem:[%s3029_s9 + $0x10] sm:$0xf0]  ;;  %v2925_v31 = vld [vmem:[%s3029_s9 + $0x10c] sm:$0xf]  ;;  %v526_v33 = vmax.f32 %v476_v19, 0.0  ;;  %v528_v34 = vmax.f32 %v478_v20, 0.0  ;;  %v2672_v37 = vor.u32 %v2894_v24, %v2671_v23 }
  0x25   : > { %v2921_v35 = vld [vmem:[%s3029_s9 + $0xec] sm:$0xf]  ;;  %v2793_v36 = vld [vmem:[%s3029_s9 + $0xf8] sm:$0xf0]  ;;  %v324_v41 = vld [vmem:[%s3042_s12 + $0x20] sm:$0xff]  ;;  %v3109_v43 = vpack.c.bf16 %v533_v26, %v531_v25  ;;  %v2676_v45 = vor.u32 %v2892_v27, %v2673_v30 }
  0x26   : > { %1518 = vmatpush.bf16.msra.mxu2 %v2724_v4  ;;  %v2809_v38 = vld [vmem:[%s3029_s9 + $0x118] sm:$0xf0]  ;;  %v326_v42 = vld [vmem:[%s3042_s12 + $0x30] sm:$0xff]  ;;  %v2796_v46 = vor.u32 %v2921_v35, %v2793_v36  ;;  %v3112_v47 = vpack.c.bf16 %v528_v34, %v526_v33  ;;  %v380_v49 = vsub.f32 %v324_v41, %v3064_v40  ;;  %v435_v51 = vand.u32 2147483647, %v385_v39  ;;  %v333_v5 = vld [vmem:[%s3042_s12 + $0x68] sm:$0xff] }
  0x27   : > { %v2812_v48 = vor.u32 %v2925_v31, %v2809_v38  ;;  %v382_v50 = vsub.f32 %v326_v42, %v3064_v40  ;;  %v437_v52 = vand.u32 2147483647, %v387_v44  ;;  %v2917_v53 = vld [vmem:[%s3029_s9 + $0xcc] sm:$0xf]  ;;  %v2777_v54 = vld [vmem:[%s3029_s9 + $0xd8] sm:$0xf0]  ;;  %v389_v12 = vsub.f32 %v333_v5, %v3031_v1 }
  0x28   : > { %1373 = vmatpush.bf16.msra.mxu0 %v2704_v9  ;;  %v2780_v55 = vor.u32 %v2917_v53, %v2777_v54  ;;  %v430_v56 = vand.u32 2147483647, %v380_v49  ;;  %v485_v59 = vsub.f32 1.0, %v435_v51  ;;  %v2759_v61 = vld [vmem:[%s3029_s9 + $0xa8] sm:$0xf]  ;;  %v335_v6 = vld [vmem:[%s3042_s12 + $0x78] sm:$0xff] }
  0x29   : > { %v432_v58 = vand.u32 2147483647, %v382_v50  ;;  %v487_v60 = vsub.f32 1.0, %v437_v52  ;;  %v2915_v62 = vld [vmem:[%s3029_s9 + $0xb4] sm:$0xf0]  ;;  %v328_v9 = vld [vmem:[%s3042_s12 + $0x40] sm:$0xff]  ;;  %v391_v13 = vsub.f32 %v335_v6, %v3031_v1 }
  0x2a   : > { %1519 = vmatpush.bf16.msra.mxu2 %v2708_v14  ;;  %v2760_v63 = vor.u32 %v2915_v62, %v2759_v61  ;;  %v480_v0 = vsub.f32 1.0, %v430_v56  ;;  %v535_v3 = vmax.f32 %v485_v59, 0.0  ;;  %v330_v10 = vld [vmem:[%s3042_s12 + $0x50] sm:$0xff]  ;;  %v384_v15 = vsub.f32 %v328_v9, %v3064_v40  ;;  %v2913_v23 = vld [vmem:[%s3029_s9 + $0xac] sm:$0xf]  ;;  %v339_v31 = vld [vmem:[%s3042_s12 + $0x98] sm:$0xff] }
  0x2b   : > { %v482_v2 = vsub.f32 1.0, %v432_v58  ;;  %v537_v4 = vmax.f32 %v487_v60, 0.0  ;;  %v386_v16 = vsub.f32 %v330_v10, %v3064_v40  ;;  %v439_v17 = vand.u32 2147483647, %v389_v12  ;;  %v2761_v24 = vld [vmem:[%s3029_s9 + $0xb8] sm:$0xf0] }
  0x2c   : > { %1374 = vmatpush.bf16.msra.mxu0 %v2688_v22  ;;  %1662 = vmatpush.bf16.msrb.mxu1 %v2760_v63  ;;  %v530_v7 = vmax.f32 %v480_v0, 0.0  ;;  %v441_v18 = vand.u32 2147483647, %v391_v13  ;;  %v434_v19 = vand.u32 2147483647, %v384_v15  ;;  %v2764_v25 = vor.u32 %v2913_v23, %v2761_v24  ;;  %v337_v30 = vld [vmem:[%s3042_s12 + $0x88] sm:$0xff] }
  0x2d   : > { %v532_v8 = vmax.f32 %v482_v2, 0.0  ;;  %v3130_v11 = vpack.c.bf16 %v537_v4, %v535_v3  ;;  %v436_v20 = vand.u32 2147483647, %v386_v16  ;;  %v489_v21 = vsub.f32 1.0, %v439_v17  ;;  %v332_v34 = vld [vmem:[%s3042_s12 + $0x60] sm:$0xff]  ;;  %v334_v35 = vld [vmem:[%s3042_s12 + $0x70] sm:$0xff] }
  0x2e   : > { %1520 = vmatpush.bf16.msra.mxu2 %v2692_v29  ;;  %v491_v22 = vsub.f32 1.0, %v441_v18  ;;  %v484_v26 = vsub.f32 1.0, %v434_v19  ;;  %v395_v38 = vsub.f32 %v339_v31, %v3031_v1  ;;  %v388_v41 = vsub.f32 %v332_v34, %v3064_v40  ;;  %v2743_v51 = vld [vmem:[%s3029_s9 + $0x88] sm:$0xf]  ;;  %v2911_v52 = vld [vmem:[%s3029_s9 + $0x94] sm:$0xf0] }
  0x2f   : > { %v3134_v14 = vpack.c.bf16 %v532_v8, %v530_v7  ;;  %v486_v27 = vsub.f32 1.0, %v436_v20  ;;  %v539_v28 = vmax.f32 %v489_v21, 0.0  ;;  %v390_v42 = vsub.f32 %v334_v35, %v3064_v40  ;;  %v341_v59 = vld [vmem:[%s3042_s12 + $0xa8] sm:$0xff]  ;;  %v343_v60 = vld [vmem:[%s3042_s12 + $0xb8] sm:$0xff]  ;;  %v336_v63 = vld [vmem:[%s3042_s12 + $0x80] sm:$0xff] }
  0x30   : > { %1375 = vmatpush.bf16.msra.mxu0 %v2672_v37  ;;  %v541_v29 = vmax.f32 %v491_v22, 0.0  ;;  %v534_v32 = vmax.f32 %v484_v26, 0.0  ;;  %v393_v37 = vsub.f32 %v337_v30, %v3031_v1  ;;  %v2744_v53 = vor.u32 %v2911_v52, %v2743_v51  ;;  %v338_v0 = vld [vmem:[%s3042_s12 + $0x90] sm:$0xff]  ;;  %v2909_v16 = vld [vmem:[%s3029_s9 + $0x8c] sm:$0xf]  ;;  %v347_v24 = vld [vmem:[%s3042_s12 + $0xd8] sm:$0xff] }
  0x31   : > { %2814 = vmatmul.msk.bf16.gmra.mxu1 %vm1328_vm0, %v3109_v43  ;;  %2827 = vmatmul.msk.bf16.gmra.mxu3 %vm1328_vm0, %v3109_v43  ;;  %v536_v33 = vmax.f32 %v486_v27, 0.0  ;;  %v397_v3 = vsub.f32 %v341_v59, %v3031_v1  ;;  %v399_v4 = vsub.f32 %v343_v60, %v3031_v1  ;;  %v392_v6 = vsub.f32 %v336_v63, %v3064_v40  ;;  %v2745_v17 = vld [vmem:[%s3029_s9 + $0x98] sm:$0xf0]  ;;  %v345_v23 = vld [vmem:[%s3042_s12 + $0xc8] sm:$0xff]  ;;  %v346_v59 = vld [vmem:[%s3042_s12 + $0xd0] sm:$0xff] }
  0x32   : > { %1521 = vmatpush.bf16.msra.mxu2 %v2676_v45  ;;  %v3150_v36 = vpack.c.bf16 %v541_v29, %v539_v28  ;;  %v443_v44 = vand.u32 2147483647, %v393_v37  ;;  %v445_v45 = vand.u32 2147483647, %v395_v38  ;;  %1663 = vmatpush.bf16.msrb.mxu1 %v2744_v53  ;;  %v394_v7 = vsub.f32 %v338_v0, %v3064_v40  ;;  %v340_v28 = vld [vmem:[%s3042_s12 + $0xa0] sm:$0xff]  ;;  %v342_v29 = vld [vmem:[%s3042_s12 + $0xb0] sm:$0xff] }
  0x33   : > { %1376 = vmatmul.bf16.vlgmr.msra.gmra.mxu0 %v3112_v47  ;;  %v3154_v39 = vpack.c.bf16 %v536_v33, %v534_v32  ;;  %v447_v8 = vand.u32 2147483647, %v397_v3  ;;  %v449_v9 = vand.u32 2147483647, %v399_v4  ;;  %v442_v10 = vand.u32 2147483647, %v392_v6 }
  0x34   : > { %1806 = vmatpush.bf16.msrb.mxu0 %v2796_v46  ;;  %v438_v46 = vand.u32 2147483647, %v388_v41  ;;  %v493_v49 = vsub.f32 1.0, %v443_v44  ;;  %v495_v50 = vsub.f32 1.0, %v445_v45  ;;  %v444_v12 = vand.u32 2147483647, %v394_v7 }
  0x35   : > { %1522 = vmatmul.bf16.vlgmr.msra.gmra.mxu2 %v3112_v47  ;;  %v497_v13 = vsub.f32 1.0, %v447_v8  ;;  %v499_v15 = vsub.f32 1.0, %v449_v9  ;;  %v2748_v18 = vor.u32 %v2909_v16, %v2745_v17  ;;  %v492_v19 = vsub.f32 1.0, %v442_v10  ;;  %v2727_v38 = vld [vmem:[%s3029_s9 + $0x68] sm:$0xf] }
  0x36   : > { %1886 = vmatpush.bf16.msrb.mxu2 %v2812_v48  ;;  %v440_v48 = vand.u32 2147483647, %v390_v42  ;;  %v488_v54 = vsub.f32 1.0, %v438_v46  ;;  %v543_v56 = vmax.f32 %v493_v49, 0.0  ;;  %v545_v58 = vmax.f32 %v495_v50, 0.0  ;;  %v349_v53 = vld [vmem:[%s3042_s12 + $0xe8] sm:$0xff] }
  0x37   : > { %v494_v20 = vsub.f32 1.0, %v444_v12  ;;  %v547_v21 = vmax.f32 %v497_v13, 0.0  ;;  %v549_v22 = vmax.f32 %v499_v15, 0.0  ;;  %v401_v27 = vsub.f32 %v345_v23, %v3031_v1  ;;  %v2907_v41 = vld [vmem:[%s3029_s9 + $0x74] sm:$0xf0] }
  0x38   : > { %1807 = vmatpush.bf16.msrb.mxu0 %v2780_v55  ;;  %v490_v55 = vsub.f32 1.0, %v440_v48  ;;  %v538_v61 = vmax.f32 %v488_v54, 0.0  ;;  %v3170_v2 = vpack.c.bf16 %v545_v58, %v543_v56  ;;  %v403_v31 = vsub.f32 %v347_v24, %v3031_v1  ;;  %v351_v54 = vld [vmem:[%s3042_s12 + $0xf8] sm:$0xff]  ;;  %v344_v58 = vld [vmem:[%s3042_s12 + $0xc0] sm:$0xff]  ;;  %v2905_v9 = vld [vmem:[%s3029_s9 + $0x6c] sm:$0xf] }
  0x39   : > { %v544_v26 = vmax.f32 %v494_v20, 0.0  ;;  %v3191_v30 = vpack.c.bf16 %v549_v22, %v547_v21  ;;  %v396_v33 = vsub.f32 %v340_v28, %v3064_v40  ;;  %v398_v34 = vsub.f32 %v342_v29, %v3064_v40  ;;  %v2729_v10 = vld [vmem:[%s3029_s9 + $0x78] sm:$0xf0]  ;;  %v353_v20 = vld [vmem:[%s3042_s12 + $0x108] sm:$0xff]  ;;  %v348_v24 = vld [vmem:[%s3042_s12 + $0xe0] sm:$0xff] }
  0x3a   : > { %v540_v62 = vmax.f32 %v490_v55, 0.0  ;;  %v451_v35 = vand.u32 2147483647, %v401_v27  ;;  %v453_v37 = vand.u32 2147483647, %v403_v31  ;;  %v2728_v42 = vor.u32 %v2907_v41, %v2727_v38  ;;  %v355_v21 = vld [vmem:[%s3042_s12 + $0x118] sm:$0xff] }
  0x3b   : > { %v446_v44 = vand.u32 2147483647, %v396_v33  ;;  %v448_v45 = vand.u32 2147483647, %v398_v34  ;;  %v400_v0 = vsub.f32 %v344_v58, %v3064_v40  ;;  %v402_v3 = vsub.f32 %v346_v59, %v3064_v40  ;;  %v2711_v29 = vld [vmem:[%s3029_s9 + $0x48] sm:$0xf] }
  0x3c   : > { %1808 = vmatpush.bf16.msrb.mxu0 %v2764_v25  ;;  %v3174_v5 = vpack.c.bf16 %v540_v62, %v538_v61  ;;  %v542_v25 = vmax.f32 %v492_v19, 0.0  ;;  %1664 = vmatpush.bf16.msrb.mxu1 %v2728_v42  ;;  %v501_v46 = vsub.f32 1.0, %v451_v35  ;;  %v503_v48 = vsub.f32 1.0, %v453_v37  ;;  %v2903_v31 = vld [vmem:[%s3029_s9 + $0x54] sm:$0xf0]  ;;  %v354_v58 = vld [vmem:[%s3042_s12 + $0x110] sm:$0xff] }
  0x3d   : > { %v496_v49 = vsub.f32 1.0, %v446_v44  ;;  %v498_v50 = vsub.f32 1.0, %v448_v45  ;;  %v405_v61 = vsub.f32 %v349_v53, %v3031_v1  ;;  %v407_v62 = vsub.f32 %v351_v54, %v3031_v1  ;;  %v359_v53 = vld [vmem:[%s3042_s12 + $0x138] sm:$0xff] }
  0x3e   : > { %v3194_v32 = vpack.c.bf16 %v544_v26, %v542_v25  ;;  %v551_v51 = vmax.f32 %v501_v46, 0.0  ;;  %v553_v52 = vmax.f32 %v503_v48, 0.0  ;;  %v450_v7 = vand.u32 2147483647, %v400_v0  ;;  %v350_v25 = vld [vmem:[%s3042_s12 + $0xf0] sm:$0xff] }
  0x3f   : > { %v546_v55 = vmax.f32 %v496_v49, 0.0  ;;  %v548_v56 = vmax.f32 %v498_v50, 0.0  ;;  %v455_v4 = vand.u32 2147483647, %v405_v61  ;;  %v457_v6 = vand.u32 2147483647, %v407_v62 }
  0x40   : > { %1809 = vmatpush.bf16.msrb.mxu0 %v2748_v18  ;;  %v3210_v60 = vpack.c.bf16 %v553_v52, %v551_v51  ;;  %v452_v8 = vand.u32 2147483647, %v402_v3  ;;  %v2732_v15 = vor.u32 %v2905_v9, %v2729_v10  ;;  %v500_v16 = vsub.f32 1.0, %v450_v7  ;;  %v357_v52 = vld [vmem:[%s3042_s12 + $0x128] sm:$0xff] }
  0x41   : > { %2815 = vmatmul.msk.bf16.gmra.mxu1 %vm1328_vm0, %v3130_v11  ;;  %2828 = vmatmul.msk.bf16.gmra.mxu3 %vm1328_vm0, %v3130_v11  ;;  %v3214_v63 = vpack.c.bf16 %v548_v56, %v546_v55  ;;  %v505_v12 = vsub.f32 1.0, %v455_v4  ;;  %v507_v13 = vsub.f32 1.0, %v457_v6  ;;  %v409_v27 = vsub.f32 %v353_v20, %v3031_v1  ;;  %v352_v56 = vld [vmem:[%s3042_s12 + $0x100] sm:$0xff]  ;;  %v2901_v3 = vld [vmem:[%s3029_s9 + $0x4c] sm:$0xf] }
  0x42   : > { %v502_v17 = vsub.f32 1.0, %v452_v8  ;;  %v550_v22 = vmax.f32 %v500_v16, 0.0  ;;  %v411_v28 = vsub.f32 %v355_v21, %v3031_v1  ;;  %v404_v34 = vsub.f32 %v348_v24, %v3064_v40  ;;  %v2713_v4 = vld [vmem:[%s3029_s9 + $0x58] sm:$0xf0]  ;;  %v2695_v20 = vld [vmem:[%s3029_s9 + $0x28] sm:$0xf] }
  0x43   : > { %1381 = vmatmul.bf16.gmra.mxu0 %v3134_v14  ;;  %v555_v18 = vmax.f32 %v505_v12, 0.0  ;;  %v557_v19 = vmax.f32 %v507_v13, 0.0  ;;  %v406_v35 = vsub.f32 %v350_v25, %v3064_v40  ;;  %v2712_v37 = vor.u32 %v2903_v31, %v2711_v29  ;;  %v2899_v21 = vld [vmem:[%s3029_s9 + $0x34] sm:$0xf0] }
  0x44   : > { %1810 = vmatpush.bf16.msrb.mxu0 %v2732_v15  ;;  %v552_v23 = vmax.f32 %v502_v17, 0.0  ;;  %v459_v38 = vand.u32 2147483647, %v409_v27  ;;  %v461_v41 = vand.u32 2147483647, %v411_v28  ;;  %v413_v61 = vsub.f32 %v357_v52, %v3031_v1  ;;  %v361_v28 = vld [vmem:[%s3042_s12 + $0x148] sm:$0xff] }
  0x45   : > { %1527 = vmatmul.bf16.gmra.mxu2 %v3134_v14  ;;  %v3230_v26 = vpack.c.bf16 %v557_v19, %v555_v18  ;;  %1665 = vmatpush.bf16.msrb.mxu1 %v2712_v37  ;;  %v454_v42 = vand.u32 2147483647, %v404_v34  ;;  %v456_v44 = vand.u32 2147483647, %v406_v35  ;;  %v415_v62 = vsub.f32 %v359_v53, %v3031_v1  ;;  %v363_v29 = vld [vmem:[%s3042_s12 + $0x158] sm:$0xff]  ;;  %v356_v37 = vld [vmem:[%s3042_s12 + $0x120] sm:$0xff] }
  0x46   : > { %v3236_v33 = vpack.c.bf16 %v552_v23, %v550_v22  ;;  %v509_v45 = vsub.f32 1.0, %v459_v38  ;;  %v511_v46 = vsub.f32 1.0, %v461_v41  ;;  %v408_v7 = vsub.f32 %v352_v56, %v3064_v40  ;;  %v358_v38 = vld [vmem:[%s3042_s12 + $0x130] sm:$0xff] }
  0x47   : > { %v504_v48 = vsub.f32 1.0, %v454_v42  ;;  %v506_v49 = vsub.f32 1.0, %v456_v44  ;;  %v410_v8 = vsub.f32 %v354_v58, %v3064_v40  ;;  %v2716_v9 = vor.u32 %v2901_v3, %v2713_v4  ;;  %v2897_v3 = vld [vmem:[%s3029_s9 + $0x2c] sm:$0xf]  ;;  %v2697_v4 = vld [vmem:[%s3029_s9 + $0x38] sm:$0xf0] }
  0x48   : > { %v559_v50 = vmax.f32 %v509_v45, 0.0  ;;  %v561_v51 = vmax.f32 %v511_v46, 0.0  ;;  %v463_v10 = vand.u32 2147483647, %v413_v61  ;;  %v465_v12 = vand.u32 2147483647, %v415_v62 }
  0x49   : > { %v554_v54 = vmax.f32 %v504_v48, 0.0  ;;  %v556_v55 = vmax.f32 %v506_v49, 0.0  ;;  %1811 = vmatpush.bf16.msrb.mxu0 %v2716_v9  ;;  %v458_v13 = vand.u32 2147483647, %v408_v7  ;;  %v460_v15 = vand.u32 2147483647, %v410_v8 }
  0x4a   : > { %v3250_v59 = vpack.c.bf16 %v561_v51, %v559_v50  ;;  %v513_v17 = vsub.f32 1.0, %v463_v10  ;;  %v515_v18 = vsub.f32 1.0, %v465_v12  ;;  %v2696_v24 = vor.u32 %v2899_v21, %v2695_v20  ;;  %v367_v20 = vld [vmem:[%s3042_s12 + $0x178] sm:$0xff] }
  0x4b   : > { %v3256_v6 = vpack.c.bf16 %v556_v55, %v554_v54  ;;  %v508_v22 = vsub.f32 1.0, %v458_v13  ;;  %v510_v23 = vsub.f32 1.0, %v460_v15  ;;  %v417_v42 = vsub.f32 %v361_v28, %v3031_v1 }
  0x4c   : > { %v563_v25 = vmax.f32 %v513_v17, 0.0  ;;  %v565_v27 = vmax.f32 %v515_v18, 0.0  ;;  %1666 = vmatpush.bf16.msrb.mxu1 %v2696_v24  ;;  %v419_v44 = vsub.f32 %v363_v29, %v3031_v1  ;;  %v412_v48 = vsub.f32 %v356_v37, %v3064_v40  ;;  %v365_v18 = vld [vmem:[%s3042_s12 + $0x168] sm:$0xff] }
  0x4d   : > { %v558_v31 = vmax.f32 %v508_v22, 0.0  ;;  %v560_v34 = vmax.f32 %v510_v23, 0.0  ;;  %v414_v49 = vsub.f32 %v358_v38, %v3064_v40  ;;  %v467_v52 = vand.u32 2147483647, %v417_v42 }
  0x4e   : > { %v3272_v41 = vpack.c.bf16 %v565_v27, %v563_v25  ;;  %v469_v53 = vand.u32 2147483647, %v419_v44  ;;  %v462_v54 = vand.u32 2147483647, %v412_v48  ;;  %v2700_v8 = vor.u32 %v2897_v3, %v2697_v4  ;;  %v360_v25 = vld [vmem:[%s3042_s12 + $0x140] sm:$0xff]  ;;  %v362_v27 = vld [vmem:[%s3042_s12 + $0x150] sm:$0xff] }
  0x4f   : > { %v3276_v46 = vpack.c.bf16 %v560_v34, %v558_v31  ;;  %v464_v55 = vand.u32 2147483647, %v414_v49  ;;  %v517_v58 = vsub.f32 1.0, %v467_v52  ;;  %v421_v24 = vsub.f32 %v365_v18, %v3031_v1  ;;  %v2895_v52 = vld [vmem:[%s3029_s9 + $0x14] sm:$0xf0] }
  0x50   : > { %v519_v61 = vsub.f32 1.0, %v469_v53  ;;  %v512_v7 = vsub.f32 1.0, %v462_v54  ;;  %1812 = vmatpush.bf16.msrb.mxu0 %v2700_v8  ;;  %v416_v31 = vsub.f32 %v360_v25, %v3064_v40  ;;  %v418_v34 = vsub.f32 %v362_v27, %v3064_v40 }
  0x51   : > { %2816 = vmatmul.msk.bf16.gmra.mxu1 %vm1328_vm0, %v3150_v36  ;;  %2829 = vmatmul.msk.bf16.gmra.mxu3 %vm1328_vm0, %v3150_v36  ;;  %v567_v15 = vmax.f32 %v517_v58, 0.0  ;;  %v471_v42 = vand.u32 2147483647, %v421_v24  ;;  %v366_v24 = vld [vmem:[%s3042_s12 + $0x170] sm:$0xff] }
  0x52   : > { %v569_v17 = vmax.f32 %v519_v61, 0.0  ;;  %v562_v21 = vmax.f32 %v512_v7, 0.0  ;;  %v466_v54 = vand.u32 2147483647, %v416_v31 }
  0x53   : > { %1386 = vmatmul.bf16.gmra.mxu0 %v3154_v39  ;;  %v521_v61 = vsub.f32 1.0, %v471_v42 }
  0x54   : > { %v3299_v28 = vpack.c.bf16 %v569_v17, %v567_v15  ;;  %v369_v17 = vld [vmem:[%s3042_s12 + $0x188] sm:$0xf] }
  0x55   : > { %1532 = vmatmul.bf16.gmra.mxu2 %v3154_v39  ;;  %v425_v27 = vsub.f32 %v369_v17, %v3031_v1 }
  0x61   : > { %2817 = vmatmul.msk.bf16.gmra.mxu1 %vm1328_vm0, %v3170_v2  ;;  %2830 = vmatmul.msk.bf16.gmra.mxu3 %vm1328_vm0, %v3170_v2 }
  0x63   : > { %1391 = vmatmul.bf16.gmra.mxu0 %v3174_v5 }
  0x65   : > { %1537 = vmatmul.bf16.gmra.mxu2 %v3174_v5 }
  0x71   : > { %2818 = vmatmul.msk.bf16.gmra.mxu1 %vm1328_vm0, %v3191_v30  ;;  %2831 = vmatmul.msk.bf16.gmra.mxu3 %vm1328_vm0, %v3191_v30 }
  0x73   : > { %1396 = vmatmul.bf16.gmra.mxu0 %v3194_v32 }
  0x75   : > { %1542 = vmatmul.bf16.gmra.mxu2 %v3194_v32 }
  0x81   : > { %2819 = vmatmul.msk.bf16.gmra.mxu1 %vm1328_vm0, %v3210_v60  ;;  %2832 = vmatmul.msk.bf16.gmra.mxu3 %vm1328_vm0, %v3210_v60 }
  0x83   : > { %1401 = vmatmul.bf16.gmra.mxu0 %v3214_v63 }
  0x85   : > { %1547 = vmatmul.bf16.gmra.mxu2 %v3214_v63 }
  0x91   : > { %2820 = vmatmul.msk.bf16.gmra.mxu1 %vm1328_vm0, %v3230_v26  ;;  %2833 = vmatmul.msk.bf16.gmra.mxu3 %vm1328_vm0, %v3230_v26 }
  0x93   : > { %1406 = vmatmul.bf16.gmra.mxu0 %v3236_v33 }
  0x95   : > { %1552 = vmatmul.bf16.gmra.mxu2 %v3236_v33 }
  0x9e   : > { %v1450_v0 = vpop.f32.mrf.mxu1 }
  0xa1   : > { %2821 = vmatmul.msk.bf16.gmra.mxu1 %vm1328_vm0, %v3250_v59  ;;  %2834 = vmatmul.msk.bf16.gmra.mxu3 %vm1328_vm0, %v3250_v59 }
  0xa3   : > { %1411 = vmatmul.bf16.gmra.mxu0 %v3256_v6 }
  0xa4   : > { %v1596_v16 = vpop.f32.mrf.mxu3 }
  0xa5   : > { %1557 = vmatmul.bf16.gmra.mxu2 %v3256_v6 }
  0xa6   : > { %v1452_v19 = vpop.f32.mrf.mxu1 }
  0xac   : > { %v1598_v35 = vpop.f32.mrf.mxu3 }
  0xae   : > { %v1455_v45 = vpop.f32.mrf.mxu1 }
  0xb0   : > { %v1377_v50 = vpop.f32.mrf.mxu0 }
  0xb1   : > { %2822 = vmatmul.msk.bf16.gmra.mxu1 %vm1328_vm0, %v3272_v41  ;;  %2835 = vmatmul.msk.bf16.gmra.mxu3 %vm1328_vm0, %v3272_v41  ;;  %v3284_v51 = vadd.f32 %v1450_v0, %v1377_v50  ;;  %v514_v0 = vsub.f32 1.0, %v464_v55  ;;  %v2679_v50 = vld [vmem:[%s3029_s9 + $0x8] sm:$0xf]  ;;  %v468_v55 = vand.u32 2147483647, %v418_v34 }
  0xb2   : > { %v2680_v53 = vor.u32 %v2895_v52, %v2679_v50  ;;  %v2681_v50 = vld [vmem:[%s3029_s9 + $0x18] sm:$0xf0] }
  0xb3   : > { %1416 = vmatmul.bf16.gmra.mxu0 %v3276_v46  ;;  %v564_v22 = vmax.f32 %v514_v0, 0.0  ;;  %v518_v4 = vsub.f32 1.0, %v468_v55 }
  0xb4   : > { %v1601_v56 = vpop.f32.mrf.mxu3  ;;  %1667 = vmatpush.bf16.msrb.mxu1 %v2680_v53 }
  0xb5   : > { %1562 = vmatmul.bf16.gmra.mxu2 %v3276_v46  ;;  %v3302_v29 = vpack.c.bf16 %v564_v22, %v562_v21  ;;  %v364_v22 = vld [vmem:[%s3042_s12 + $0x160] sm:$0xff] }
  0xb6   : > { %v1457_v62 = vpop.f32.mrf.mxu1 }
  0xb8   : > { %v1523_v9 = vpop.f32.mrf.mxu2  ;;  %v1379_v10 = vpop.f32.mrf.mxu0 }
  0xb9   : > { %v3290_v12 = vadd.f32 %v1596_v16, %v1523_v9  ;;  %v3292_v13 = vadd.f32 %v1452_v19, %v1379_v10  ;;  %v423_v16 = vsub.f32 %v367_v20, %v3031_v1  ;;  %v571_v10 = vmax.f32 %v521_v61, 0.0 }
  0xba   : > { %v568_v20 = vmax.f32 %v518_v4, 0.0  ;;  %v475_v1 = vand.u32 2147483647, %v425_v27 }
  0xbb   : > { %v473_v49 = vand.u32 2147483647, %v423_v16 }
  0xbc   : > { %v1603_v23 = vpop.f32.mrf.mxu3  ;;  %v525_v61 = vsub.f32 1.0, %v475_v1 }
  0xbe   : > { %v1460_v19 = vpop.f32.mrf.mxu1 }
  0xc0   : > { %v1525_v37 = vpop.f32.mrf.mxu2  ;;  %v1382_v38 = vpop.f32.mrf.mxu0 }
  0xc1   : > { %2823 = vmatmul.msk.bf16.gmra.mxu1 %vm1328_vm0, %v3299_v28  ;;  %2836 = vmatmul.msk.bf16.gmra.mxu3 %vm1328_vm0, %v3299_v28  ;;  %v3310_v44 = vadd.f32 %v1598_v35, %v1525_v37  ;;  %v3312_v48 = vadd.f32 %v1455_v45, %v1382_v38  ;;  %v523_v35 = vsub.f32 1.0, %v473_v49  ;;  %v516_v45 = vsub.f32 1.0, %v466_v54  ;;  %v2893_v49 = vld [vmem:[%s3029_s9 + $0xc] sm:$0xf] }
  0xc2   : > { %v2684_v52 = vor.u32 %v2893_v49, %v2681_v50 }
  0xc3   : > { %1421 = vmatmul.bf16.gmra.mxu0 %v3302_v29  ;;  %v573_v15 = vmax.f32 %v523_v35, 0.0  ;;  %v566_v18 = vmax.f32 %v516_v45, 0.0 }
  0xc4   : > { %v1606_v58 = vpop.f32.mrf.mxu3  ;;  %1813 = vmatpush.bf16.msrb.mxu0 %v2684_v52 }
  0xc5   : > { %1567 = vmatmul.bf16.gmra.mxu2 %v3302_v29  ;;  %v3325_v25 = vpack.c.bf16 %v573_v15, %v571_v10  ;;  %v3328_v31 = vpack.c.bf16 %v568_v20, %v566_v18  ;;  %v575_v15 = vmax.f32 %v525_v61, 0.0 }
  0xc6   : > { %v1462_v3 = vpop.f32.mrf.mxu1 }
  0xc7   : > { %v3355_v27 = vpack.c.bf16 %v575_v15, %v575_v15 }
  0xc8   : > { %v1528_v7 = vpop.f32.mrf.mxu2  ;;  %v1384_v0 = vpop.f32.mrf.mxu0 }
  0xc9   : > { %v3318_v8 = vadd.f32 %v1601_v56, %v1528_v7  ;;  %v3320_v9 = vadd.f32 %v1457_v62, %v1384_v0  ;;  %v420_v56 = vsub.f32 %v364_v22, %v3064_v40  ;;  %v422_v62 = vsub.f32 %v366_v24, %v3064_v40  ;;  %v368_v22 = vld [vmem:[%s3042_s12 + $0x180] sm:$0xf]  ;;  %v2067_v24 = vld [vmem:[%s4351_s5 + $0x78] sm:$0xff] }
  0xca   : > { %2186 = vmatpush.msra.mxu1 %v2067_v24  ;;  %v2081_v24 = vld [vmem:[%s4351_s5 + $0xe8] sm:$0xff] }
  0xcb   : > { %v470_v53 = vand.u32 2147483647, %v420_v56  ;;  %v472_v54 = vand.u32 2147483647, %v422_v62 }
  0xcc   : > { %v1608_v21 = vpop.f32.mrf.mxu3 }
  0xcd   : > { %v522_v45 = vsub.f32 1.0, %v472_v54 }
  0xce   : > { %v1465_v16 = vpop.f32.mrf.mxu1 }
  0xcf   : > { %v572_v18 = vmax.f32 %v522_v45, 0.0 }
  0xd0   : > { %v1530_v34 = vpop.f32.mrf.mxu2  ;;  %v1387_v37 = vpop.f32.mrf.mxu0 }
  0xd1   : > { %2824 = vmatmul.msk.bf16.gmra.mxu1 %vm1328_vm0, %v3325_v25  ;;  %2837 = vmatmul.msk.bf16.gmra.mxu3 %vm1328_vm0, %v3325_v25  ;;  %v3336_v38 = vadd.f32 %v1603_v23, %v1530_v34  ;;  %v3338_v42 = vadd.f32 %v1460_v19, %v1387_v37  ;;  %v2083_v23 = vld [vmem:[%s4351_s5 + $0xf8] sm:$0xff]  ;;  %v520_v19 = vsub.f32 1.0, %v470_v53  ;;  %v3376_v53 = vld [vmem:[%s4351_s5 + $0x1a8] sm:$0xff] }
  0xd2   : > { %2278 = vmatpush.msra.mxu3 %v2083_v23  ;;  %2472 = vmatpush.msra.mxu2 %v3376_v53 }
  0xd3   : > { %1426 = vmatmul.bf16.gmra.mxu0 %v3328_v31  ;;  %v570_v17 = vmax.f32 %v520_v19, 0.0 }
  0xd4   : > { %v1611_v55 = vpop.f32.mrf.mxu3 }
  0xd5   : > { %1572 = vmatmul.bf16.gmra.mxu2 %v3328_v31  ;;  %v3357_v62 = vpack.c.bf16 %v572_v18, %v570_v17 }
  0xd6   : > { %v1467_v35 = vpop.f32.mrf.mxu1 }
  0xd8   : > { %v1533_v4 = vpop.f32.mrf.mxu2  ;;  %v1389_v7 = vpop.f32.mrf.mxu0 }
  0xd9   : > { %v3347_v0 = vadd.f32 %v1606_v58, %v1533_v4  ;;  %v3349_v10 = vadd.f32 %v1462_v3, %v1389_v7  ;;  %v424_v58 = vsub.f32 %v368_v22, %v3064_v40  ;;  %v2082_v40 = vld [vmem:[%s4351_s5 + $0xf0] sm:$0xff]  ;;  %v3389_v7 = vld [vmem:[%s4351_s5 + $0x178] sm:$0xff] }
  0xda   : > { %2279 = vmatpush.msra.mxu3 %v2082_v40  ;;  %2370 = vmatpush.msra.mxu0 %v3389_v7 }
  0xdb   : > { %v474_v49 = vand.u32 2147483647, %v424_v58 }
  0xdc   : > { %v1613_v20 = vpop.f32.mrf.mxu3  ;;  %2280 = vmatpush.msra.mxu3 %v2081_v24 }
  0xde   : > { %v1470_v56 = vpop.f32.mrf.mxu1 }
  0xe0   : > { %v1535_v34 = vpop.f32.mrf.mxu2  ;;  %v1392_v3 = vpop.f32.mrf.mxu0 }
  0xe1   : > { %2825 = vmatmul.msk.bf16.gmra.mxu1 %vm1328_vm0, %v3355_v27  ;;  %2838 = vmatmul.msk.bf16.gmra.mxu3 %vm1328_vm0, %v3355_v27  ;;  %v3364_v37 = vadd.f32 %v1608_v21, %v1535_v34  ;;  %v3366_v1 = vadd.f32 %v1465_v16, %v1392_v3  ;;  %v2066_v21 = vld [vmem:[%s4351_s5 + $0x70] sm:$0xff]  ;;  %v524_v16 = vsub.f32 1.0, %v474_v49  ;;  %v2065_v3 = vld [vmem:[%s4351_s5 + $0x68] sm:$0xff] }
  0xe2   : > { %2187 = vmatpush.msra.mxu1 %v2066_v21 }
  0xe3   : > { %1431 = vmatmul.bf16.gmra.mxu0 %v3357_v62  ;;  %v574_v45 = vmax.f32 %v524_v16, 0.0 }
  0xe4   : > { %v1616_v50 = vpop.f32.mrf.mxu3  ;;  %2188 = vmatpush.msra.mxu1 %v2065_v3 }
  0xe5   : > { %1577 = vmatmul.bf16.gmra.mxu2 %v3357_v62  ;;  %v3392_v17 = vpack.c.bf16 %v574_v45, %v574_v45 }
  0xe6   : > { %v1472_v52 = vpop.f32.mrf.mxu1 }
  0xe8   : > { %v1538_v54 = vpop.f32.mrf.mxu2  ;;  %v1394_v61 = vpop.f32.mrf.mxu0 }
  0xe9   : > { %v3382_v23 = vadd.f32 %v1611_v55, %v1538_v54  ;;  %v3384_v19 = vadd.f32 %v1467_v35, %v1394_v61  ;;  %v2080_v61 = vld [vmem:[%s4351_s5 + $0xe0] sm:$0xff] }
  0xea   : > { %2281 = vmatpush.msra.mxu3 %v2080_v61  ;;  %v3448_v61 = vld [vmem:[%s4351_s5 + $0x1a0] sm:$0xff] }
  0xeb   : > { %2473 = vmatpush.msra.mxu2 %v3448_v61 }
  0xec   : > { %v1618_v4 = vpop.f32.mrf.mxu3 }
  0xee   : > { %v1475_v15 = vpop.f32.mrf.mxu1 }
  0xf0   : > { %v1540_v18 = vpop.f32.mrf.mxu2  ;;  %v1397_v22 = vpop.f32.mrf.mxu0 }
  0xf1   : > { %1668 = vmatmul.bf16.vlgmr.msrb.gmra.mxu1 %v3112_v47  ;;  %2839 = vmatmul.msk.bf16.vlgmr.msrb.gmra.mxu3 %vm1328_vm0, %v3076_v57  ;;  %v3397_v55 = vadd.f32 %v1613_v20, %v1540_v18  ;;  %v3399_v35 = vadd.f32 %v1470_v56, %v1397_v22  ;;  %v3412_v20 = vld [vmem:[%s4351_s5 + $0x170] sm:$0xff] }
  0xf2   : > { %2371 = vmatpush.msra.mxu0 %v3412_v20 }
  0xf3   : > { %1436 = vmatmul.bf16.gmra.mxu0 %v3392_v17 }
  0xf4   : > { %v1621_v58 = vpop.f32.mrf.mxu3 }
  0xf5   : > { %1582 = vmatmul.bf16.gmra.mxu2 %v3392_v17 }
  0xf6   : > { %v1477_v34 = vpop.f32.mrf.mxu1 }
  0xf8   : > { %v1543_v56 = vpop.f32.mrf.mxu2  ;;  %v1399_v49 = vpop.f32.mrf.mxu0 }
  0xf9   : > { %v3415_v40 = vadd.f32 %v1616_v50, %v1543_v56  ;;  %v3417_v21 = vadd.f32 %v1472_v52, %v1399_v49  ;;  %v2064_v52 = vld [vmem:[%s4351_s5 + $0x60] sm:$0xff]  ;;  %v3438_v56 = vld [vmem:[%s4351_s5 + $0x168] sm:$0xff] }
  0xfa   : > { %2189 = vmatpush.msra.mxu1 %v2064_v52  ;;  %2372 = vmatpush.msra.mxu0 %v3438_v56 }
  0xfc   : > { %v1623_v16 = vpop.f32.mrf.mxu3 }
  0xfe   : > { %v1480_v54 = vpop.f32.mrf.mxu1 }
 0x100   : > { %v1545_v45 = vpop.f32.mrf.mxu2  ;;  %v1402_v18 = vpop.f32.mrf.mxu0 }
 0x101   : > { %1673 = vmatmul.bf16.gmra.mxu1 %v3134_v14  ;;  %2840 = vmatmul.msk.bf16.gmra.mxu3 %vm1328_vm0, %v3109_v43  ;;  %v3425_v22 = vadd.f32 %v1618_v4, %v1545_v45  ;;  %v3427_v50 = vadd.f32 %v1475_v15, %v1402_v18  ;;  %v2079_v45 = vld [vmem:[%s4351_s5 + $0xd8] sm:$0xff] }
 0x102   : > { %2282 = vmatpush.msra.mxu3 %v2079_v45  ;;  %v3468_v45 = vld [vmem:[%s4351_s5 + $0x160] sm:$0xff] }
 0x103   : > { %4354 = vst [vmem:[#allocation2_spill] sm:$0xff] %v3427_v50  ;;  %1814 = vmatmul.bf16.vlgmr.msrb.gmra.mxu0 %v3112_v47 }
 0x104   : > { %v1626_v24 = vpop.f32.mrf.mxu3  ;;  %2373 = vmatpush.msra.mxu0 %v3468_v45 }
 0x105   : > { %2852 = vmatmul.msk.bf16.vlgmr.msrb.gmra.mxu2 %vm1328_vm0, %v3076_v57 }
 0x106   : > { %v1482_v3 = vpop.f32.mrf.mxu1 }
 0x108   : > { %v1548_v4 = vpop.f32.mrf.mxu2  ;;  %v1404_v15 = vpop.f32.mrf.mxu0 }
 0x109   : > { %v3441_v47 = vadd.f32 %v1621_v58, %v1548_v4  ;;  %v3443_v49 = vadd.f32 %v1477_v34, %v1404_v15  ;;  %v2063_v58 = vld [vmem:[%s4351_s5 + $0x58] sm:$0xff] }
 0x10a   : > { %2190 = vmatpush.msra.mxu1 %v2063_v58 }
 0x10b   : > { %4355 = vst [vmem:[#allocation3_spill] sm:$0xff] %v3441_v47 }
 0x10c   : > { %4356 = vst [vmem:[#allocation4_spill] sm:$0xff] %v3443_v49  ;;  %v1628_v57 = vpop.f32.mrf.mxu3 }
 0x10e   : > { %v1485_v18 = vpop.f32.mrf.mxu1 }
 0x110   : > { %v1550_v34 = vpop.f32.mrf.mxu2  ;;  %v1407_v52 = vpop.f32.mrf.mxu0 }
 0x111   : > { %1678 = vmatmul.bf16.gmra.mxu1 %v3154_v39  ;;  %2841 = vmatmul.msk.bf16.gmra.mxu3 %vm1328_vm0, %v3130_v11  ;;  %v3460_v4 = vadd.f32 %v1623_v16, %v1550_v34  ;;  %v3462_v15 = vadd.f32 %v1480_v54, %v1407_v52  ;;  %v2078_v16 = vld [vmem:[%s4351_s5 + $0xd0] sm:$0xff] }
 0x112   : > { %2283 = vmatpush.msra.mxu3 %v2078_v16 }
 0x113   : > { %4357 = vst [vmem:[#allocation5_spill] sm:$0xff] %v3460_v4  ;;  %1819 = vmatmul.bf16.gmra.mxu0 %v3134_v14  ;;  %v2062_v4 = vld [vmem:[%s4351_s5 + $0x50] sm:$0xff] }
 0x114   : > { %4358 = vst [vmem:[#allocation6_spill] sm:$0xff] %v3462_v15  ;;  %v1631_v49 = vpop.f32.mrf.mxu3  ;;  %2191 = vmatpush.msra.mxu1 %v2062_v4 }
 0x115   : > { %2853 = vmatmul.msk.bf16.gmra.mxu2 %vm1328_vm0, %v3109_v43  ;;  %v3486_v43 = vld [vmem:[%s4351_s5 + $0x158] sm:$0xff] }
 0x116   : > { %v1487_v58 = vpop.f32.mrf.mxu1  ;;  %2374 = vmatpush.msra.mxu0 %v3486_v43 }
 0x118   : > { %v1553_v54 = vpop.f32.mrf.mxu2  ;;  %v1409_v34 = vpop.f32.mrf.mxu0 }
 0x119   : > { %v3476_v14 = vadd.f32 %v1626_v24, %v1553_v54  ;;  %v3478_v52 = vadd.f32 %v1482_v3, %v1409_v34  ;;  %v2077_v34 = vld [vmem:[%s4351_s5 + $0xc8] sm:$0xff] }
 0x11a   : > { %2284 = vmatpush.msra.mxu3 %v2077_v34  ;;  %v3518_v34 = vld [vmem:[%s4351_s5 + $0x198] sm:$0xff] }
 0x11b   : > { %4359 = vst [vmem:[#allocation7_spill] sm:$0xff] %v3476_v14  ;;  %2474 = vmatpush.msra.mxu2 %v3518_v34 }
 0x11c   : > { %4360 = vst [vmem:[#allocation8_spill] sm:$0xff] %v3478_v52  ;;  %v1633_v15 = vpop.f32.mrf.mxu3  ;;  %v2061_v52 = vld [vmem:[%s4351_s5 + $0x48] sm:$0xff] }
 0x11d   : > { %2192 = vmatpush.msra.mxu1 %v2061_v52 }
 0x11e   : > { %v1490_v47 = vpop.f32.mrf.mxu1 }
 0x120   : > { %v1555_v16 = vpop.f32.mrf.mxu2  ;;  %v1412_v50 = vpop.f32.mrf.mxu0 }
 0x121   : > { %1683 = vmatmul.bf16.gmra.mxu1 %v3174_v5  ;;  %2842 = vmatmul.msk.bf16.gmra.mxu3 %vm1328_vm0, %v3150_v36  ;;  %v3492_v24 = vadd.f32 %v1628_v57, %v1555_v16  ;;  %v3494_v3 = vadd.f32 %v1485_v18, %v1412_v50 }
 0x123   : > { %4361 = vst [vmem:[#allocation9_spill] sm:$0xff] %v3492_v24  ;;  %1824 = vmatmul.bf16.gmra.mxu0 %v3154_v39  ;;  %v2060_v24 = vld [vmem:[%s4351_s5 + $0x40] sm:$0xff] }
 0x124   : > { %4362 = vst [vmem:[#allocation10_spill] sm:$0xff] %v3494_v3  ;;  %v1636_v4 = vpop.f32.mrf.mxu3  ;;  %2193 = vmatpush.msra.mxu1 %v2060_v24 }
 0x125   : > { %2854 = vmatmul.msk.bf16.gmra.mxu2 %vm1328_vm0, %v3130_v11  ;;  %v3512_v11 = vld [vmem:[%s4351_s5 + $0x150] sm:$0xff] }
 0x126   : > { %v1492_v54 = vpop.f32.mrf.mxu1  ;;  %2375 = vmatpush.msra.mxu0 %v3512_v11 }
 0x128   : > { %v1558_v57 = vpop.f32.mrf.mxu2  ;;  %v1414_v50 = vpop.f32.mrf.mxu0 }
 0x129   : > { %v3505_v18 = vadd.f32 %v1631_v49, %v1558_v57  ;;  %v3507_v39 = vadd.f32 %v1487_v58, %v1414_v50  ;;  %v2076_v50 = vld [vmem:[%s4351_s5 + $0xc0] sm:$0xff] }
 0x12a   : > { %2285 = vmatpush.msra.mxu3 %v2076_v50 }
 0x12b   : > { %4363 = vst [vmem:[#allocation11_spill] sm:$0xff] %v3505_v18 }
 0x12c   : > { %4364 = vst [vmem:[#allocation12_spill] sm:$0xff] %v3507_v39  ;;  %v1638_v16 = vpop.f32.mrf.mxu3 }
 0x12e   : > { %v1495_v3 = vpop.f32.mrf.mxu1 }
 0x130   : > { %v1560_v49 = vpop.f32.mrf.mxu2  ;;  %v1417_v52 = vpop.f32.mrf.mxu0 }
 0x131   : > { %1688 = vmatmul.bf16.gmra.mxu1 %v3194_v32  ;;  %2843 = vmatmul.msk.bf16.gmra.mxu3 %vm1328_vm0, %v3170_v2  ;;  %v3524_v58 = vadd.f32 %v1633_v15, %v1560_v49  ;;  %v3526_v57 = vadd.f32 %v1490_v47, %v1417_v52  ;;  %v3540_v47 = vld [vmem:[%s4351_s5 + $0x148] sm:$0xff] }
 0x132   : > { %2376 = vmatpush.msra.mxu0 %v3540_v47 }
 0x133   : > { %4365 = vst [vmem:[#allocation13_spill] sm:$0xff] %v3524_v58  ;;  %1829 = vmatmul.bf16.gmra.mxu0 %v3174_v5 }
 0x134   : > { %4366 = vst [vmem:[#allocation14_spill] sm:$0xff] %v3526_v57  ;;  %v1641_v39 = vpop.f32.mrf.mxu3  ;;  %v2075_v57 = vld [vmem:[%s4351_s5 + $0xb8] sm:$0xff] }
 0x135   : > { %2855 = vmatmul.msk.bf16.gmra.mxu2 %vm1328_vm0, %v3150_v36  ;;  %2286 = vmatpush.msra.mxu3 %v2075_v57 }
 0x136   : > { %v1497_v18 = vpop.f32.mrf.mxu1 }
 0x138   : > { %v1563_v5 = vpop.f32.mrf.mxu2  ;;  %v1419_v15 = vpop.f32.mrf.mxu0 }
 0x139   : > { %v3543_v49 = vadd.f32 %v1636_v4, %v1563_v5  ;;  %v3545_v52 = vadd.f32 %v1492_v54, %v1419_v15  ;;  %v2059_v5 = vld [vmem:[%s4351_s5 + $0x38] sm:$0xff]  ;;  %v3566_v15 = vld [vmem:[%s4351_s5 + $0x140] sm:$0xff] }
 0x13a   : > { %2194 = vmatpush.msra.mxu1 %v2059_v5  ;;  %2377 = vmatpush.msra.mxu0 %v3566_v15 }
 0x13b   : > { %4367 = vst [vmem:[#allocation15_spill] sm:$0xff] %v3543_v49 }
 0x13c   : > { %4368 = vst [vmem:[#allocation16_spill] sm:$0xff] %v3545_v52  ;;  %v1643_v36 = vpop.f32.mrf.mxu3 }
 0x13e   : > { %v1500_v50 = vpop.f32.mrf.mxu1 }
 0x140   : > { %v1565_v58 = vpop.f32.mrf.mxu2  ;;  %v1422_v14 = vpop.f32.mrf.mxu0 }
 0x141   : > { %1693 = vmatmul.bf16.gmra.mxu1 %v3214_v63  ;;  %2844 = vmatmul.msk.bf16.gmra.mxu3 %vm1328_vm0, %v3191_v30  ;;  %v3553_v24 = vadd.f32 %v1638_v16, %v1565_v58  ;;  %v3555_v4 = vadd.f32 %v1495_v3, %v1422_v14 }
 0x143   : > { %4369 = vst [vmem:[#allocation17_spill] sm:$0xff] %v3553_v24  ;;  %1834 = vmatmul.bf16.gmra.mxu0 %v3194_v32 }
 0x144   : > { %4370 = vst [vmem:[#allocation18_spill] sm:$0xff] %v3555_v4  ;;  %v1646_v54 = vpop.f32.mrf.mxu3  ;;  %v3579_v4 = vld [vmem:[%s4351_s5 + $0x190] sm:$0xff] }
 0x145   : > { %2856 = vmatmul.msk.bf16.gmra.mxu2 %vm1328_vm0, %v3170_v2  ;;  %v2074_v2 = vld [vmem:[%s4351_s5 + $0xb0] sm:$0xff] }
 0x146   : > { %v1502_v57 = vpop.f32.mrf.mxu1  ;;  %2287 = vmatpush.msra.mxu3 %v2074_v2  ;;  %2475 = vmatpush.msra.mxu2 %v3579_v4 }
 0x148   : > { %v1568_v14 = vpop.f32.mrf.mxu2  ;;  %v1424_v3 = vpop.f32.mrf.mxu0 }
 0x149   : > { %v3569_v32 = vadd.f32 %v1641_v39, %v1568_v14  ;;  %v3571_v16 = vadd.f32 %v1497_v18, %v1424_v3  ;;  %v2058_v14 = vld [vmem:[%s4351_s5 + $0x30] sm:$0xff] }
 0x14a   : > { %2195 = vmatpush.msra.mxu1 %v2058_v14 }
 0x14b   : > { %4371 = vst [vmem:[#allocation19_spill] sm:$0xff] %v3569_v32 }
 0x14c   : > { %4372 = vst [vmem:[#allocation20_spill] sm:$0xff] %v3571_v16  ;;  %v1648_v58 = vpop.f32.mrf.mxu3  ;;  %v3598_v16 = vld [vmem:[%s4351_s5 + $0x138] sm:$0xff] }
 0x14d   : > { %2378 = vmatpush.msra.mxu0 %v3598_v16 }
 0x14e   : > { %v1505_v5 = vpop.f32.mrf.mxu1 }
 0x150   : > { %v1570_v24 = vpop.f32.mrf.mxu2  ;;  %v1427_v52 = vpop.f32.mrf.mxu0 }
 0x151   : > { %1698 = vmatmul.bf16.gmra.mxu1 %v3236_v33  ;;  %2845 = vmatmul.msk.bf16.gmra.mxu3 %vm1328_vm0, %v3210_v60  ;;  %v3585_v18 = vadd.f32 %v1643_v36, %v1570_v24  ;;  %v3587_v39 = vadd.f32 %v1500_v50, %v1427_v52  ;;  %v2073_v52 = vld [vmem:[%s4351_s5 + $0xa8] sm:$0xff] }
 0x152   : > { %2288 = vmatpush.msra.mxu3 %v2073_v52 }
 0x153   : > { %4373 = vst [vmem:[#allocation21_spill] sm:$0xff] %v3585_v18  ;;  %1839 = vmatmul.bf16.gmra.mxu0 %v3214_v63 }
 0x154   : > { %4374 = vst [vmem:[#allocation22_spill] sm:$0xff] %v3587_v39  ;;  %v1651_v3 = vpop.f32.mrf.mxu3  ;;  %v2057_v39 = vld [vmem:[%s4351_s5 + $0x28] sm:$0xff] }
 0x155   : > { %2857 = vmatmul.msk.bf16.gmra.mxu2 %vm1328_vm0, %v3191_v30  ;;  %2196 = vmatpush.msra.mxu1 %v2057_v39 }
 0x156   : > { %v1507_v2 = vpop.f32.mrf.mxu1 }
 0x158   : > { %v1573_v36 = vpop.f32.mrf.mxu2  ;;  %v1429_v50 = vpop.f32.mrf.mxu0 }
 0x159   : > { %v3604_v63 = vadd.f32 %v1646_v54, %v1573_v36  ;;  %v3606_v24 = vadd.f32 %v1502_v57, %v1429_v50  ;;  %v3621_v57 = vld [vmem:[%s4351_s5 + $0x130] sm:$0xff] }
 0x15a   : > { %2379 = vmatpush.msra.mxu0 %v3621_v57 }
 0x15b   : > { %4375 = vst [vmem:[#allocation23_spill] sm:$0xff] %v3604_v63 }
 0x15c   : > { %4376 = vst [vmem:[#allocation24_spill] sm:$0xff] %v3606_v24  ;;  %v1653_v30 = vpop.f32.mrf.mxu3  ;;  %v2052_v24 = vld [vmem:[%s4351_s5] sm:$0xff] }
 0x15e   : > { %v1510_v14 = vpop.f32.mrf.mxu1 }
 0x160   : > { %v1575_v18 = vpop.f32.mrf.mxu2  ;;  %v1432_v32 = vpop.f32.mrf.mxu0 }
 0x161   : > { %1703 = vmatmul.bf16.gmra.mxu1 %v3256_v6  ;;  %2846 = vmatmul.msk.bf16.gmra.mxu3 %vm1328_vm0, %v3230_v26  ;;  %v3614_v49 = vadd.f32 %v1648_v58, %v1575_v18  ;;  %v3616_v54 = vadd.f32 %v1505_v5, %v1432_v32  ;;  %v2072_v58 = vld [vmem:[%s4351_s5 + $0xa0] sm:$0xff] }
 0x162   : > { %2289 = vmatpush.msra.mxu3 %v2072_v58  ;;  %v3654_v58 = vld [vmem:[%s4351_s5 + $0x188] sm:$0xff] }
 0x163   : > { %4377 = vst [vmem:[#allocation25_spill] sm:$0xff] %v3614_v49  ;;  %1844 = vmatmul.bf16.gmra.mxu0 %v3236_v33  ;;  %v2056_v33 = vld [vmem:[%s4351_s5 + $0x20] sm:$0xff]  ;;  %2476 = vmatpush.msra.mxu2 %v3654_v58 }
 0x164   : > { %4378 = vst [vmem:[#allocation26_spill] sm:$0xff] %v3616_v54  ;;  %v1656_v52 = vpop.f32.mrf.mxu3  ;;  %2197 = vmatpush.msra.mxu1 %v2056_v33 }
 0x165   : > { %2858 = vmatmul.msk.bf16.gmra.mxu2 %vm1328_vm0, %v3210_v60  ;;  %v3640_v60 = vld [vmem:[%s4351_s5 + $0x128] sm:$0xff] }
 0x166   : > { %v1512_v39 = vpop.f32.mrf.mxu1  ;;  %2380 = vmatpush.msra.mxu0 %v3640_v60 }
 0x168   : > { %v1578_v32 = vpop.f32.mrf.mxu2  ;;  %v1434_v5 = vpop.f32.mrf.mxu0 }
 0x169   : > { %v3630_v18 = vadd.f32 %v1651_v3, %v1578_v32  ;;  %v3632_v36 = vadd.f32 %v1507_v2, %v1434_v5 }
 0x16b   : > { %4379 = vst [vmem:[#allocation27_spill] sm:$0xff] %v3630_v18 }
 0x16c   : > { %4380 = vst [vmem:[#allocation28_spill] sm:$0xff] %v3632_v36  ;;  %v1658_v50 = vpop.f32.mrf.mxu3 }
 0x16e   : > { %v1669_v54 = vpop.f32.mrf.mxu1 }
 0x170   : > { %v1580_v39 = vpop.f32.mrf.mxu2  ;;  %v1437_v49 = vpop.f32.mrf.mxu0 }
 0x171   : > { %1708 = vmatmul.bf16.gmra.mxu1 %v3276_v46  ;;  %2847 = vmatmul.msk.bf16.gmra.mxu3 %vm1328_vm0, %v3250_v59  ;;  %v3646_v3 = vadd.f32 %v1653_v30, %v1580_v39  ;;  %v3648_v2 = vadd.f32 %v1510_v14, %v1437_v49  ;;  %v2071_v49 = vld [vmem:[%s4351_s5 + $0x98] sm:$0xff] }
 0x172   : > { %2290 = vmatpush.msra.mxu3 %v2071_v49 }
 0x173   : > { %4381 = vst [vmem:[#allocation29_spill] sm:$0xff] %v3646_v3  ;;  %1849 = vmatmul.bf16.gmra.mxu0 %v3256_v6  ;;  %v2055_v6 = vld [vmem:[%s4351_s5 + $0x18] sm:$0xff] }
 0x174   : > { %4382 = vst [vmem:[#allocation30_spill] sm:$0xff] %v3648_v2  ;;  %v1742_v32 = vpop.f32.mrf.mxu3  ;;  %2198 = vmatpush.msra.mxu1 %v2055_v6 }
 0x175   : > { %v3657_v5 = vadd.f32 %v1742_v32, %v1669_v54  ;;  %2859 = vmatmul.msk.bf16.gmra.mxu2 %vm1328_vm0, %v3230_v26  ;;  %v3672_v54 = vld [vmem:[%s4351_s5 + $0x120] sm:$0xff] }
 0x176   : > { %v1671_v33 = vpop.f32.mrf.mxu1  ;;  %2381 = vmatpush.msra.mxu0 %v3672_v54 }
 0x178   : > { %v1583_v30 = vpop.f32.mrf.mxu2  ;;  %v1439_v14 = vpop.f32.mrf.mxu0 }
 0x179   : > { %v3667_v50 = vadd.f32 %v1656_v52, %v1583_v30  ;;  %v2070_v52 = vld [vmem:[%s4351_s5 + $0x90] sm:$0xff]  ;;  %v3694_v30 = vld [vmem:[%s4351_s5 + $0x118] sm:$0xff] }
 0x17a   : > { %2291 = vmatpush.msra.mxu3 %v2070_v52  ;;  %2382 = vmatpush.msra.mxu0 %v3694_v30 }
 0x17b   : > { %4383 = vst [vmem:[#allocation31_spill] sm:$0xff] %v3667_v50 }
 0x17c   : > { %v1744_v26 = vpop.f32.mrf.mxu3 }
 0x17d   : > { %v3675_v39 = vadd.f32 %v1744_v26, %v1671_v33  ;;  %v2054_v33 = vld [vmem:[%s4351_s5 + $0x10] sm:$0xff] }
 0x17e   : > { %v1674_v32 = vpop.f32.mrf.mxu1  ;;  %2199 = vmatpush.msra.mxu1 %v2054_v33 }
 0x180   : > { %v1585_v2 = vpop.f32.mrf.mxu2  ;;  %v1815_v3 = vpop.f32.mrf.mxu0 }
 0x181   : > { %1713 = vmatmul.bf16.gmra.mxu1 %v3302_v29  ;;  %2848 = vmatmul.msk.bf16.gmra.mxu3 %vm1328_vm0, %v3272_v41 }
 0x183   : > { %1854 = vmatmul.bf16.gmra.mxu0 %v3276_v46 }
 0x184   : > { %v1747_v49 = vpop.f32.mrf.mxu3 }
 0x185   : > { %v3684_v6 = vadd.f32 %v1747_v49, %v1674_v32  ;;  %2860 = vmatmul.msk.bf16.gmra.mxu2 %vm1328_vm0, %v3250_v59  ;;  %v2069_v49 = vld [vmem:[%s4351_s5 + $0x88] sm:$0xff] }
 0x186   : > { %v1676_v2 = vpop.f32.mrf.mxu1  ;;  %2292 = vmatpush.msra.mxu3 %v2069_v49  ;;  %v3720_v49 = vld [vmem:[%s4351_s5 + $0x110] sm:$0xff] }
 0x187   : > { %2383 = vmatpush.msra.mxu0 %v3720_v49 }
 0x188   : > { %v1888_v14 = vpop.f32.mrf.mxu2  ;;  %v1817_v26 = vpop.f32.mrf.mxu0 }
 0x189   : > { %v3697_v46 = vadd.f32 %v1888_v14, %v1815_v3  ;;  %v2053_v3 = vld [vmem:[%s4351_s5 + $0x8] sm:$0xff] }
 0x18a   : > { %2200 = vmatpush.msra.mxu1 %v2053_v3 }
 0x18c   : > { %v1749_v32 = vpop.f32.mrf.mxu3  ;;  %2201 = vmatpush.msra.mxu1 %v2052_v24 }
 0x18d   : > { %v3699_v52 = vadd.f32 %v1749_v32, %v1676_v2 }
 0x18e   : > { %v1679_v59 = vpop.f32.mrf.mxu1  ;;  %2928 = vmatpush.msrb.mxu1 %v3389_v7 }
 0x190   : > { %v1890_v50 = vpop.f32.mrf.mxu2  ;;  %v1820_v36 = vpop.f32.mrf.mxu0  ;;  %2929 = vmatpush.msrb.mxu1 %v3412_v20 }
 0x191   : > { %1718 = vmatmul.bf16.gmra.mxu1 %v3328_v31  ;;  %2849 = vmatmul.msk.bf16.gmra.mxu3 %vm1328_vm0, %v3299_v28  ;;  %v3707_v33 = vadd.f32 %v1890_v50, %v1817_v26  ;;  %v2100_v50 = vld [vmem:[%s4351_s5 + $0x180] sm:$0xff] }
 0x192   : > { %2477 = vmatpush.msra.mxu2 %v2100_v50  ;;  %2930 = vmatpush.msrb.mxu1 %v3438_v56 }
 0x193   : > { %1859 = vmatmul.bf16.gmra.mxu0 %v3302_v29 }
 0x194   : > { %v1752_v2 = vpop.f32.mrf.mxu3  ;;  %2931 = vmatpush.msrb.mxu1 %v3468_v45  ;;  %v577_v45 = vld [vmem:[%s3770_s19 + $0x8] sm:$0xff] }
 0x195   : > { %v3713_v14 = vadd.f32 %v1752_v2, %v1679_v59  ;;  %2861 = vmatmul.msk.bf16.gmra.mxu2 %vm1328_vm0, %v3272_v41  ;;  %v2068_v41 = vld [vmem:[%s4351_s5 + $0x80] sm:$0xff] }
 0x196   : > { %v1681_v32 = vpop.f32.mrf.mxu1  ;;  %2293 = vmatpush.msra.mxu3 %v2068_v41  ;;  %2932 = vmatpush.msrb.mxu1 %v3486_v43 }
 0x198   : > { %v1893_v26 = vpop.f32.mrf.mxu2  ;;  %v1822_v3 = vpop.f32.mrf.mxu0  ;;  %2944 = vmatpush.msrb.mxu3 %v3376_v53  ;;  %v3746_v53 = vld [vmem:[%s4351_s5 + $0x108] sm:$0xff]  ;;  %2933 = vmatpush.msrb.mxu1 %v3512_v11 }
 0x199   : > { %v3726_v29 = vadd.f32 %v1893_v26, %v1820_v36  ;;  %2384 = vmatpush.msra.mxu0 %v3746_v53 }
 0x19a   : > { %2945 = vmatpush.msrb.mxu3 %v3448_v61  ;;  %2934 = vmatpush.msrb.mxu1 %v3540_v47 }
 0x19c   : > { %v1754_v59 = vpop.f32.mrf.mxu3  ;;  %2946 = vmatpush.msrb.mxu3 %v3518_v34  ;;  %2935 = vmatpush.msrb.mxu1 %v3566_v15 }
 0x19d   : > { %v3731_v2 = vadd.f32 %v1754_v59, %v1681_v32  ;;  %v2084_v59 = vld [vmem:[%s4351_s5 + $0x100] sm:$0xff] }
 0x19e   : > { %v1684_v18 = vpop.f32.mrf.mxu1  ;;  %2947 = vmatpush.msrb.mxu3 %v3579_v4  ;;  %v576_v4 = vld [vmem:[%s3770_s19] sm:$0xff]  ;;  %2385 = vmatpush.msra.mxu0 %v2084_v59 }
 0x19f   : > { %2936 = vmatpush.msrb.mxu1 %v3598_v16 }
 0x1a0   : > { %v1895_v36 = vpop.f32.mrf.mxu2  ;;  %v1825_v26 = vpop.f32.mrf.mxu0  ;;  %2948 = vmatpush.msrb.mxu3 %v3654_v58 }
 0x1a1   : > { %1723 = vmatmul.bf16.gmra.mxu1 %v3357_v62  ;;  %2850 = vmatmul.msk.bf16.gmra.mxu3 %vm1328_vm0, %v3325_v25  ;;  %v3741_v32 = vadd.f32 %v1895_v36, %v1822_v3 }
 0x1a2   : > { %2949 = vmatpush.msrb.mxu3 %v2100_v50  ;;  %2937 = vmatpush.msrb.mxu1 %v3621_v57 }
 0x1a3   : > { %1864 = vmatmul.bf16.gmra.mxu0 %v3328_v31  ;;  %v3764_v31 = vld [vmem:[%s4350_s4] sm:$0xf] }
 0x1a4   : > { %v1757_v61 = vpop.f32.mrf.mxu3  ;;  %v3776_v56 = vperm.slane %v3764_v31, 0  ;;  %v3779_v34 = vperm.slane %v3764_v31, 1  ;;  %2938 = vmatpush.msrb.mxu1 %v3640_v60  ;;  %v3818_v60 = vperm.slane %v3764_v31, 2 }
 0x1a5   : > { %v3754_v24 = vadd.f32 %v1757_v61, %v1684_v18  ;;  %2862 = vmatmul.msk.bf16.gmra.mxu2 %vm1328_vm0, %v3299_v28 }
 0x1a6   : > { %v1686_v3 = vpop.f32.mrf.mxu1  ;;  %v686_v43 = vsub.f32 %v576_v4, %v3776_v56  ;;  %v687_v50 = vsub.f32 %v577_v45, %v3779_v34  ;;  %2939 = vmatpush.msrb.mxu1 %v3672_v54 }
 0x1a8   : > { %v1898_v7 = vpop.f32.mrf.mxu2  ;;  %v1827_v20 = vpop.f32.mrf.mxu0  ;;  %v786_v47 = vand.u32 2147483647, %v686_v43  ;;  %v787_v61 = vand.u32 2147483647, %v687_v50  ;;  %2940 = vmatpush.msrb.mxu1 %v3694_v30 }
 0x1a9   : > { %v3772_v28 = vadd.f32 %v1898_v7, %v1825_v26  ;;  %v581_v7 = vld [vmem:[%s3770_s19 + $0x28] sm:$0xff] }
 0x1aa   : > { %v691_v16 = vsub.f32 %v581_v7, %v3779_v34  ;;  %v887_v43 = vsub.f32 1.0, %v787_v61  ;;  %v585_v7 = vld [vmem:[%s3770_s19 + $0x48] sm:$0xff]  ;;  %2941 = vmatpush.msrb.mxu1 %v3720_v49 }
 0x1ab   : > { %v695_v49 = vsub.f32 %v585_v7, %v3779_v34 }
 0x1ac   : > { %v1759_v18 = vpop.f32.mrf.mxu3  ;;  %2942 = vmatpush.msrb.mxu1 %v3746_v53 }
 0x1ad   : > { %v3784_v58 = vadd.f32 %v1759_v18, %v1686_v3  ;;  %v580_v3 = vld [vmem:[%s3770_s19 + $0x20] sm:$0xff]  ;;  %v886_v18 = vsub.f32 1.0, %v786_v47 }
 0x1ae   : > { %v1689_v41 = vpop.f32.mrf.mxu1  ;;  %v690_v15 = vsub.f32 %v580_v3, %v3776_v56  ;;  %v987_v3 = vmax.f32 %v887_v43, 0.0  ;;  %v3829_v43 = vperm.slane %v3764_v31, 3  ;;  %2943 = vmatpush.msrb.mxu1 %v2084_v59 }
 0x1b0   : > { %v1900_v36 = vpop.f32.mrf.mxu2  ;;  %v1830_v26 = vpop.f32.mrf.mxu0 }
 0x1b1   : > { %1728 = vmatmul.bf16.gmra.mxu1 %v3392_v17  ;;  %2851 = vmatmul.msk.bf16.gmra.mxu3 %vm1328_vm0, %v3355_v27  ;;  %v3796_v11 = vadd.f32 %v1900_v36, %v1827_v20  ;;  %v986_v36 = vmax.f32 %v886_v18, 0.0  ;;  %v1953_v18 = vmul.f32 %v3290_v12, %v987_v3  ;;  %v588_v3 = vld [vmem:[%s3770_s19 + $0x60] sm:$0xff] }
 0x1b3   : > { %1869 = vmatmul.bf16.gmra.mxu0 %v3357_v62  ;;  %v1952_v30 = vmul.f32 %v3284_v51, %v986_v36  ;;  %v795_v36 = vand.u32 2147483647, %v695_v49 }
 0x1b4   : > { %v1762_v4 = vpop.f32.mrf.mxu3 }
 0x1b5   : > { %v3803_v45 = vadd.f32 %v1762_v4, %v1689_v41  ;;  %2863 = vmatmul.msk.bf16.gmra.mxu2 %vm1328_vm0, %v3325_v25  ;;  %v790_v41 = vand.u32 2147483647, %v690_v15  ;;  %v791_v25 = vand.u32 2147483647, %v691_v16  ;;  %v584_v4 = vld [vmem:[%s3770_s19 + $0x40] sm:$0xff]  ;;  %v578_v15 = vld [vmem:[%s3770_s19 + $0x10] sm:$0xff] }
 0x1b6   : > { %v1691_v20 = vpop.f32.mrf.mxu1  ;;  %v694_v61 = vsub.f32 %v584_v4, %v3776_v56  ;;  %v589_v4 = vld [vmem:[%s3770_s19 + $0x68] sm:$0xff] }
 0x1b7   : > { %4384 = vst [vmem:[#allocation32_spill] sm:$0xff] %v3803_v45  ;;  %v890_v54 = vsub.f32 1.0, %v790_v41  ;;  %v688_v41 = vsub.f32 %v578_v15, %v3818_v60 }
 0x1b8   : > { %v1903_v62 = vpop.f32.mrf.mxu2  ;;  %v1832_v50 = vpop.f32.mrf.mxu0  ;;  %v794_v51 = vand.u32 2147483647, %v694_v61  ;;  %v698_v61 = vsub.f32 %v588_v3, %v3776_v56 }
 0x1b9   : > { %v3811_v57 = vadd.f32 %v1903_v62, %v1830_v26  ;;  %v891_v26 = vsub.f32 1.0, %v791_v25  ;;  %v990_v25 = vmax.f32 %v890_v54, 0.0  ;;  %v788_v59 = vand.u32 2147483647, %v688_v41 }
 0x1ba   : > { %v699_v54 = vsub.f32 %v589_v4, %v3779_v34  ;;  %v798_v3 = vand.u32 2147483647, %v698_v61 }
 0x1bb   : > { %v991_v12 = vmax.f32 %v891_v26, 0.0  ;;  %v582_v26 = vld [vmem:[%s3770_s19 + $0x30] sm:$0xff]  ;;  %v888_v41 = vsub.f32 1.0, %v788_v59 }
 0x1bc   : > { %v1764_v63 = vpop.f32.mrf.mxu3  ;;  %v799_v4 = vand.u32 2147483647, %v699_v54  ;;  %v586_v54 = vld [vmem:[%s3770_s19 + $0x50] sm:$0xff] }
 0x1bd   : > { %v3820_v47 = vadd.f32 %v1764_v63, %v1691_v20  ;;  %v579_v63 = vld [vmem:[%s3770_s19 + $0x18] sm:$0xff] }
 0x1be   : > { %v1694_v16 = vpop.f32.mrf.mxu1  ;;  %v689_v31 = vsub.f32 %v579_v63, %v3829_v43 }
 0x1bf   : > { %4385 = vst [vmem:[#allocation33_spill] sm:$0xff] %v3820_v47 }
 0x1c0   : > { %v1905_v20 = vpop.f32.mrf.mxu2  ;;  %v1835_v62 = vpop.f32.mrf.mxu0  ;;  %v789_v49 = vand.u32 2147483647, %v689_v31 }
 0x1c1   : > { %2202 = vmatmul.f32.vlgmr.msra.gmra.mxu1 %v1952_v30  ;;  %2294 = vmatmul.f32.vlgmr.msra.gmra.mxu3 %v1953_v18  ;;  %v3833_v53 = vadd.f32 %v1905_v20, %v1832_v50  ;;  %v894_v50 = vsub.f32 1.0, %v794_v51  ;;  %v1956_v30 = vmul.f32 %v3292_v13, %v990_v25  ;;  %v1957_v18 = vmul.f32 %v3310_v44, %v991_v12  ;;  %v593_v44 = vld [vmem:[%s3770_s19 + $0x88] sm:$0xff] }
 0x1c2   : > { %v889_v12 = vsub.f32 1.0, %v789_v49  ;;  %v703_v61 = vsub.f32 %v593_v44, %v3779_v34 }
 0x1c3   : > { %1874 = vmatmul.bf16.gmra.mxu0 %v3392_v17  ;;  %v895_v17 = vsub.f32 1.0, %v795_v36  ;;  %v994_v13 = vmax.f32 %v894_v50, 0.0 }
 0x1c4   : > { %v1767_v7 = vpop.f32.mrf.mxu3  ;;  %v989_v49 = vmax.f32 %v889_v12, 0.0  ;;  %v597_v12 = vld [vmem:[%s3770_s19 + $0xa8] sm:$0xff] }
 0x1c5   : > { %v3839_v47 = vadd.f32 %v1767_v7, %v1694_v16  ;;  %2864 = vmatmul.msk.bf16.gmra.mxu2 %vm1328_vm0, %v3355_v27  ;;  %v583_v16 = vld [vmem:[%s3770_s19 + $0x38] sm:$0xff]  ;;  %v692_v27 = vsub.f32 %v582_v26, %v3818_v60  ;;  %v995_v25 = vmax.f32 %v895_v17, 0.0  ;;  %v592_v7 = vld [vmem:[%s3770_s19 + $0x80] sm:$0xff]  ;;  %v898_v26 = vsub.f32 1.0, %v798_v3 }
 0x1c6   : > { %v1696_v15 = vpop.f32.mrf.mxu1  ;;  %v693_v36 = vsub.f32 %v583_v16, %v3829_v43 }
 0x1c7   : > { %4386 = vst [vmem:[#allocation34_spill] sm:$0xff] %v3839_v47  ;;  %v988_v47 = vmax.f32 %v888_v41, 0.0  ;;  %v792_v59 = vand.u32 2147483647, %v692_v27  ;;  %v1961_v17 = vmul.f32 %v3318_v8, %v995_v25  ;;  %v998_v44 = vmax.f32 %v898_v26, 0.0  ;;  %v596_v25 = vld [vmem:[%s3770_s19 + $0xa0] sm:$0xff] }
 0x1c8   : > { %v1908_v63 = vpop.f32.mrf.mxu2  ;;  %v1837_v20 = vpop.f32.mrf.mxu0  ;;  %v793_v16 = vand.u32 2147483647, %v693_v36  ;;  %v1955_v36 = vmul.f32 %v3697_v46, %v989_v49 }
 0x1c9   : > { %2205 = vmatmul.f32.gmra.mxu1 %v1956_v30  ;;  %2297 = vmatmul.f32.gmra.mxu3 %v1957_v18  ;;  %v3850_v51 = vadd.f32 %v1908_v63, %v1835_v62  ;;  %v899_v30 = vsub.f32 1.0, %v799_v4  ;;  %v702_v62 = vsub.f32 %v592_v7, %v3776_v56  ;;  %v1960_v18 = vmul.f32 %v3312_v48, %v994_v13  ;;  %v587_v63 = vld [vmem:[%s3770_s19 + $0x58] sm:$0xff] }
 0x1ca   : > { %v1954_v27 = vmul.f32 %v3657_v5, %v988_v47  ;;  %v892_v3 = vsub.f32 1.0, %v792_v59  ;;  %v696_v4 = vsub.f32 %v586_v54, %v3818_v60  ;;  %v803_v13 = vand.u32 2147483647, %v703_v61 }
 0x1cb   : > { %v802_v48 = vand.u32 2147483647, %v702_v62  ;;  %v999_v8 = vmax.f32 %v899_v30, 0.0  ;;  %v697_v5 = vsub.f32 %v587_v63, %v3829_v43  ;;  %v706_v30 = vsub.f32 %v596_v25, %v3776_v56 }
 0x1cc   : > { %v1769_v31 = vpop.f32.mrf.mxu3  ;;  %v992_v59 = vmax.f32 %v892_v3, 0.0  ;;  %v796_v54 = vand.u32 2147483647, %v696_v4  ;;  %v903_v62 = vsub.f32 1.0, %v803_v13  ;;  %v707_v61 = vsub.f32 %v597_v12, %v3779_v34  ;;  %v601_v12 = vld [vmem:[%s3770_s19 + $0xc8] sm:$0xff] }
 0x1cd   : > { %v3855_v45 = vadd.f32 %v1769_v31, %v1696_v15  ;;  %v893_v31 = vsub.f32 1.0, %v793_v16  ;;  %v902_v26 = vsub.f32 1.0, %v802_v48  ;;  %v1965_v49 = vmul.f32 %v3336_v38, %v999_v8  ;;  %v600_v8 = vld [vmem:[%s3770_s19 + $0xc0] sm:$0xff] }
 0x1ce   : > { %v1699_v50 = vpop.f32.mrf.mxu1  ;;  %v797_v63 = vand.u32 2147483647, %v697_v5  ;;  %v1958_v3 = vmul.f32 %v3675_v39, %v992_v59  ;;  %v896_v4 = vsub.f32 1.0, %v796_v54  ;;  %v1003_v38 = vmax.f32 %v903_v62, 0.0 }
 0x1cf   : > { %v993_v16 = vmax.f32 %v893_v31, 0.0  ;;  %v1002_v25 = vmax.f32 %v902_v26, 0.0  ;;  %v710_v62 = vsub.f32 %v600_v8, %v3776_v56 }
 0x1d0   : > { %v1910_v41 = vpop.f32.mrf.mxu2  ;;  %v1840_v15 = vpop.f32.mrf.mxu0  ;;  %v897_v31 = vsub.f32 1.0, %v797_v63 }
 0x1d1   : > { %2208 = vmatmul.f32.gmra.mxu1 %v1960_v18  ;;  %2300 = vmatmul.f32.gmra.mxu3 %v1961_v17  ;;  %v3865_v7 = vadd.f32 %v1910_v41, %v1837_v20  ;;  %v590_v18 = vld [vmem:[%s3770_s19 + $0x70] sm:$0xff]  ;;  %v1964_v17 = vmul.f32 %v3320_v9, %v998_v44  ;;  %v806_v9 = vand.u32 2147483647, %v706_v30  ;;  %v807_v44 = vand.u32 2147483647, %v707_v61 }
 0x1d2   : > { %v700_v48 = vsub.f32 %v590_v18, %v3818_v60  ;;  %v711_v30 = vsub.f32 %v601_v12, %v3779_v34  ;;  %v594_v61 = vld [vmem:[%s3770_s19 + $0x90] sm:$0xff]  ;;  %v1968_v18 = vmul.f32 %v3338_v42, %v1002_v25  ;;  %v810_v42 = vand.u32 2147483647, %v710_v62 }
 0x1d3   : > { %2386 = vmatmul.f32.vlgmr.msra.gmra.mxu0 %v1954_v27  ;;  %v907_v26 = vsub.f32 1.0, %v807_v44  ;;  %v604_v44 = vld [vmem:[%s3770_s19 + $0xe0] sm:$0xff] }
 0x1d4   : > { %v1772_v47 = vpop.f32.mrf.mxu3  ;;  %v800_v59 = vand.u32 2147483647, %v700_v48  ;;  %v811_v25 = vand.u32 2147483647, %v711_v30 }
 0x1d5   : > { %v3871_v20 = vadd.f32 %v1772_v47, %v1699_v50  ;;  %2865 = vmatmul.msk.f32.vlgmr.msra.gmra.mxu2 %vm2110_vm1, %v1955_v36  ;;  %v591_v50 = vld [vmem:[%s3770_s19 + $0x78] sm:$0xff]  ;;  %v1959_v36 = vmul.f32 %v3707_v33, %v993_v16  ;;  %v996_v47 = vmax.f32 %v896_v4, 0.0  ;;  %v704_v4 = vsub.f32 %v594_v61, %v3818_v60 }
 0x1d6   : > { %v1701_v46 = vpop.f32.mrf.mxu1  ;;  %v701_v5 = vsub.f32 %v591_v50, %v3829_v43 }
 0x1d8   : > { %v1913_v41 = vpop.f32.mrf.mxu2  ;;  %v1842_v27 = vpop.f32.mrf.mxu0  ;;  %v801_v16 = vand.u32 2147483647, %v701_v5  ;;  %v804_v5 = vand.u32 2147483647, %v704_v4 }
 0x1d9   : > { %2211 = vmatmul.f32.gmra.mxu1 %v1964_v17  ;;  %2303 = vmatmul.f32.gmra.mxu3 %v1965_v49  ;;  %v3882_v13 = vadd.f32 %v1913_v41, %v1840_v15  ;;  %v906_v15 = vsub.f32 1.0, %v806_v9  ;;  %v1969_v17 = vmul.f32 %v3347_v0, %v1003_v38  ;;  %v997_v49 = vmax.f32 %v897_v31, 0.0  ;;  %v605_v38 = vld [vmem:[%s3770_s19 + $0xe8] sm:$0xff] }
 0x1da   : > { %v1962_v41 = vmul.f32 %v3684_v6, %v996_v47  ;;  %v1007_v0 = vmax.f32 %v907_v26, 0.0  ;;  %v901_v12 = vsub.f32 1.0, %v801_v16  ;;  %v911_v47 = vsub.f32 1.0, %v811_v25  ;;  %v598_v26 = vld [vmem:[%s3770_s19 + $0xb0] sm:$0xff] }
 0x1db   : > { %2389 = vmatmul.f32.gmra.mxu0 %v1958_v3  ;;  %v900_v3 = vsub.f32 1.0, %v800_v59  ;;  %v1006_v9 = vmax.f32 %v906_v15, 0.0  ;;  %v1963_v8 = vmul.f32 %v3726_v29, %v997_v49  ;;  %v714_v59 = vsub.f32 %v604_v44, %v3776_v56 }
 0x1dc   : > { %v1774_v39 = vpop.f32.mrf.mxu3  ;;  %v715_v15 = vsub.f32 %v605_v38, %v3779_v34  ;;  %v1973_v30 = vmul.f32 %v3364_v37, %v1007_v0  ;;  %v1001_v61 = vmax.f32 %v901_v12, 0.0  ;;  %v1011_v37 = vmax.f32 %v911_v47, 0.0 }
 0x1dd   : > { %v3888_v54 = vadd.f32 %v1774_v39, %v1701_v46  ;;  %2866 = vmatmul.msk.f32.gmra.mxu2 %vm2110_vm1, %v1959_v36  ;;  %v595_v46 = vld [vmem:[%s3770_s19 + $0x98] sm:$0xff]  ;;  %v1000_v31 = vmax.f32 %v900_v3, 0.0  ;;  %v1972_v62 = vmul.f32 %v3349_v10, %v1006_v9  ;;  %v814_v10 = vand.u32 2147483647, %v714_v59  ;;  %v608_v9 = vld [vmem:[%s3770_s19 + $0x100] sm:$0xff] }
 0x1de   : > { %v1704_v33 = vpop.f32.mrf.mxu1  ;;  %v705_v36 = vsub.f32 %v595_v46, %v3829_v43  ;;  %v904_v46 = vsub.f32 1.0, %v804_v5  ;;  %v815_v4 = vand.u32 2147483647, %v715_v15  ;;  %v1967_v25 = vmul.f32 %v3741_v32, %v1001_v61  ;;  %v602_v5 = vld [vmem:[%s3770_s19 + $0xd0] sm:$0xff] }
 0x1df   : > { %v1966_v16 = vmul.f32 %v3699_v52, %v1000_v31  ;;  %v1977_v47 = vmul.f32 %v3382_v23, %v1011_v37 }
 0x1e0   : > { %v1915_v63 = vpop.f32.mrf.mxu2  ;;  %v1845_v50 = vpop.f32.mrf.mxu0  ;;  %v1004_v38 = vmax.f32 %v904_v46, 0.0  ;;  %v612_v46 = vld [vmem:[%s3770_s19 + $0x120] sm:$0xff] }
 0x1e1   : > { %2214 = vmatmul.f32.gmra.mxu1 %v1968_v18  ;;  %2306 = vmatmul.f32.gmra.mxu3 %v1969_v17  ;;  %v3899_v48 = vadd.f32 %v1915_v63, %v1842_v27  ;;  %v910_v27 = vsub.f32 1.0, %v810_v42  ;;  %v805_v18 = vand.u32 2147483647, %v705_v36  ;;  %v708_v63 = vsub.f32 %v598_v26, %v3818_v60  ;;  %v609_v42 = vld [vmem:[%s3770_s19 + $0x108] sm:$0xff]  ;;  %v603_v26 = vld [vmem:[%s3770_s19 + $0xd8] sm:$0xff] }
 0x1e2   : > { %v915_v36 = vsub.f32 1.0, %v815_v4  ;;  %v719_v31 = vsub.f32 %v609_v42, %v3779_v34  ;;  %v713_v4 = vsub.f32 %v603_v26, %v3829_v43 }
 0x1e3   : > { %2392 = vmatmul.f32.gmra.mxu0 %v1962_v41  ;;  %v1010_v3 = vmax.f32 %v910_v27, 0.0  ;;  %v905_v0 = vsub.f32 1.0, %v805_v18  ;;  %v712_v18 = vsub.f32 %v602_v5, %v3818_v60 }
 0x1e4   : > { %v1777_v6 = vpop.f32.mrf.mxu3  ;;  %v1015_v23 = vmax.f32 %v915_v36, 0.0  ;;  %v813_v36 = vand.u32 2147483647, %v713_v4 }
 0x1e5   : > { %v3905_v39 = vadd.f32 %v1777_v6, %v1704_v33  ;;  %2867 = vmatmul.msk.f32.gmra.mxu2 %vm2110_vm1, %v1963_v8  ;;  %v599_v33 = vld [vmem:[%s3770_s19 + $0xb8] sm:$0xff]  ;;  %v808_v8 = vand.u32 2147483647, %v708_v63  ;;  %v718_v6 = vsub.f32 %v608_v9, %v3776_v56  ;;  %v1976_v27 = vmul.f32 %v3366_v1, %v1010_v3  ;;  %v613_v63 = vld [vmem:[%s3770_s19 + $0x128] sm:$0xff] }
 0x1e6   : > { %v1706_v29 = vpop.f32.mrf.mxu1  ;;  %v709_v44 = vsub.f32 %v599_v33, %v3829_v43  ;;  %v1005_v59 = vmax.f32 %v905_v0, 0.0  ;;  %v812_v9 = vand.u32 2147483647, %v712_v18  ;;  %v722_v0 = vsub.f32 %v612_v46, %v3776_v56 }
 0x1e7   : > { %v908_v61 = vsub.f32 1.0, %v808_v8  ;;  %v818_v1 = vand.u32 2147483647, %v718_v6  ;;  %v1981_v8 = vmul.f32 %v3397_v55, %v1015_v23  ;;  %v607_v6 = vld [vmem:[%s3770_s19 + $0xf8] sm:$0xff]  ;;  %v913_v18 = vsub.f32 1.0, %v813_v36  ;;  %v620_v36 = vld [vmem:[%s3770_s19 + $0x160] sm:$0xff] }
 0x1e8   : > { %v1918_v17 = vpop.f32.mrf.mxu2  ;;  %v1847_v49 = vpop.f32.mrf.mxu0  ;;  %v809_v15 = vand.u32 2147483647, %v709_v44  ;;  %v1971_v3 = vmul.f32 %v3772_v28, %v1005_v59  ;;  %v723_v44 = vsub.f32 %v613_v63, %v3779_v34 }
 0x1e9   : > { %2217 = vmatmul.f32.gmra.mxu1 %v1972_v62  ;;  %2309 = vmatmul.f32.gmra.mxu3 %v1973_v30  ;;  %v3916_v41 = vadd.f32 %v1918_v17, %v1845_v50  ;;  %v914_v50 = vsub.f32 1.0, %v814_v10  ;;  %v1970_v30 = vmul.f32 %v3713_v14, %v1004_v38  ;;  %v1008_v37 = vmax.f32 %v908_v61, 0.0 }
 0x1ea   : > { %v909_v10 = vsub.f32 1.0, %v809_v15  ;;  %v823_v26 = vand.u32 2147483647, %v723_v44 }
 0x1eb   : > { %2395 = vmatmul.f32.gmra.mxu0 %v1966_v16  ;;  %v1014_v17 = vmax.f32 %v914_v50, 0.0  ;;  %v819_v16 = vand.u32 2147483647, %v719_v31 }
 0x1ec   : > { %v1779_v52 = vpop.f32.mrf.mxu3  ;;  %v1009_v50 = vmax.f32 %v909_v10, 0.0  ;;  %v923_v46 = vsub.f32 1.0, %v823_v26  ;;  %v610_v10 = vld [vmem:[%s3770_s19 + $0x110] sm:$0xff] }
 0x1ed   : > { %v3922_v12 = vadd.f32 %v1779_v52, %v1706_v29  ;;  %2868 = vmatmul.msk.f32.gmra.mxu2 %vm2110_vm1, %v1967_v25  ;;  %v919_v25 = vsub.f32 1.0, %v819_v16  ;;  %v606_v52 = vld [vmem:[%s3770_s19 + $0xf0] sm:$0xff]  ;;  %v1980_v38 = vmul.f32 %v3384_v19, %v1014_v17  ;;  %v822_v19 = vand.u32 2147483647, %v722_v0 }
 0x1ee   : > { %v1709_v32 = vpop.f32.mrf.mxu1  ;;  %v1975_v61 = vmul.f32 %v3796_v11, %v1009_v50  ;;  %v717_v17 = vsub.f32 %v607_v6, %v3829_v43  ;;  %v621_v6 = vld [vmem:[%s3770_s19 + $0x168] sm:$0xff] }
 0x1ef   : > { %v1019_v55 = vmax.f32 %v919_v25, 0.0 }
 0x1f0   : > { %v1920_v29 = vpop.f32.mrf.mxu2  ;;  %v1850_v62 = vpop.f32.mrf.mxu0 }
 0x1f1   : > { %2220 = vmatmul.f32.gmra.mxu1 %v1976_v27  ;;  %2312 = vmatmul.f32.gmra.mxu3 %v1977_v47  ;;  %v3933_v33 = vadd.f32 %v1920_v29, %v1847_v49  ;;  %v918_v49 = vsub.f32 1.0, %v818_v1  ;;  %v912_v27 = vsub.f32 1.0, %v812_v9  ;;  %v716_v47 = vsub.f32 %v606_v52, %v3818_v60  ;;  %v616_v29 = vld [vmem:[%s3770_s19 + $0x140] sm:$0xff] }
 0x1f2   : > { %v726_v63 = vsub.f32 %v616_v29, %v3776_v56  ;;  %v817_v9 = vand.u32 2147483647, %v717_v17  ;;  %v731_v29 = vsub.f32 %v621_v6, %v3779_v34 }
 0x1f3   : > { %2398 = vmatmul.f32.gmra.mxu0 %v1970_v30  ;;  %v1018_v15 = vmax.f32 %v918_v49, 0.0  ;;  %v617_v30 = vld [vmem:[%s3770_s19 + $0x148] sm:$0xff]  ;;  %v1012_v1 = vmax.f32 %v912_v27, 0.0  ;;  %v816_v16 = vand.u32 2147483647, %v716_v47  ;;  %v611_v49 = vld [vmem:[%s3770_s19 + $0x118] sm:$0xff] }
 0x1f4   : > { %v1782_v14 = vpop.f32.mrf.mxu3  ;;  %v721_v27 = vsub.f32 %v611_v49, %v3829_v43 }
 0x1f5   : > { %v3939_v42 = vadd.f32 %v1782_v14, %v1709_v32  ;;  %2869 = vmatmul.msk.f32.gmra.mxu2 %vm2110_vm1, %v1971_v3  ;;  %v1974_v32 = vmul.f32 %v3731_v2, %v1008_v37  ;;  %v727_v3 = vsub.f32 %v617_v30, %v3779_v34  ;;  %v1984_v4 = vmul.f32 %v3399_v35, %v1018_v15  ;;  %v614_v30 = vld [vmem:[%s3770_s19 + $0x130] sm:$0xff] }
 0x1f6   : > { %v1711_v28 = vpop.f32.mrf.mxu1  ;;  %v1985_v14 = vmul.f32 %v3415_v40, %v1019_v55  ;;  %v1013_v37 = vmax.f32 %v913_v18, 0.0  ;;  %v1978_v44 = vmul.f32 %v3754_v24, %v1012_v1  ;;  %v916_v52 = vsub.f32 1.0, %v816_v16  ;;  %v615_v1 = vld [vmem:[%s3770_s19 + $0x138] sm:$0xff] }
 0x1f7   : > { %v826_v35 = vand.u32 2147483647, %v726_v63  ;;  %v827_v50 = vand.u32 2147483647, %v727_v3  ;;  %v1023_v40 = vmax.f32 %v923_v46, 0.0  ;;  %v730_v55 = vsub.f32 %v620_v36, %v3776_v56  ;;  %v4387_v36 = vld [vmem:[#allocation2_spill] sm:$0xff] }
 0x1f8   : > { %v1923_v31 = vpop.f32.mrf.mxu2  ;;  %v1852_v5 = vpop.f32.mrf.mxu0  ;;  %v1016_v47 = vmax.f32 %v916_v52, 0.0  ;;  %v724_v3 = vsub.f32 %v614_v30, %v3818_v60 }
 0x1f9   : > { %2223 = vmatmul.f32.gmra.mxu1 %v1980_v38  ;;  %2315 = vmatmul.f32.gmra.mxu3 %v1981_v8  ;;  %v3950_v59 = vadd.f32 %v1923_v31, %v1850_v62  ;;  %v922_v62 = vsub.f32 1.0, %v822_v19  ;;  %v1979_v31 = vmul.f32 %v3811_v57, %v1013_v37  ;;  %v927_v26 = vsub.f32 1.0, %v827_v50  ;;  %v625_v37 = vld [vmem:[%s3770_s19 + $0x188] sm:$0xff] }
 0x1fa   : > { %v1989_v18 = vmul.f32 %v3425_v22, %v1023_v40  ;;  %v1982_v46 = vmul.f32 %v3784_v58, %v1016_v47  ;;  %v824_v52 = vand.u32 2147483647, %v724_v3  ;;  %v735_v50 = vsub.f32 %v625_v37, %v3779_v34  ;;  %v618_v40 = vld [vmem:[%s3770_s19 + $0x150] sm:$0xff]  ;;  %v619_v47 = vld [vmem:[%s3770_s19 + $0x158] sm:$0xff] }
 0x1fb   : > { %2401 = vmatmul.f32.gmra.mxu0 %v1974_v32  ;;  %v1022_v8 = vmax.f32 %v922_v62, 0.0  ;;  %v917_v32 = vsub.f32 1.0, %v817_v9  ;;  %v1027_v22 = vmax.f32 %v927_v26, 0.0  ;;  %v4389_v26 = vld [vmem:[#allocation32_spill] sm:$0xff]  ;;  %v728_v30 = vsub.f32 %v618_v40, %v3818_v60 }
 0x1fc   : > { %v1784_v2 = vpop.f32.mrf.mxu3  ;;  %v729_v3 = vsub.f32 %v619_v47, %v3829_v43 }
 0x1fd   : > { %v3956_v23 = vadd.f32 %v1784_v2, %v1711_v28  ;;  %2870 = vmatmul.msk.f32.gmra.mxu2 %vm2110_vm1, %v1975_v61  ;;  %v720_v28 = vsub.f32 %v610_v10, %v3818_v60  ;;  %v1988_v61 = vmul.f32 %v3417_v21, %v1022_v8  ;;  %v1017_v17 = vmax.f32 %v917_v32, 0.0 }
 0x1fe   : > { %v1714_v11 = vpop.f32.mrf.mxu1  ;;  %v821_v2 = vand.u32 2147483647, %v721_v27  ;;  %v830_v21 = vand.u32 2147483647, %v730_v55 }
 0x1ff   : > { %v820_v15 = vand.u32 2147483647, %v720_v28  ;;  %v1983_v9 = vmul.f32 %v3833_v53, %v1017_v17  ;;  %v835_v17 = vand.u32 2147483647, %v735_v50 }
 0x200   : > { %v1925_v25 = vpop.f32.mrf.mxu2  ;;  %v1855_v0 = vpop.f32.mrf.mxu0  ;;  %v921_v49 = vsub.f32 1.0, %v821_v2 }
 0x201   : > { %2226 = vmatmul.f32.gmra.mxu1 %v1984_v4  ;;  %2318 = vmatmul.f32.gmra.mxu3 %v1985_v14  ;;  %v3967_v38 = vadd.f32 %v1925_v25, %v1852_v5  ;;  %v926_v5 = vsub.f32 1.0, %v826_v35  ;;  %v920_v63 = vsub.f32 1.0, %v820_v15  ;;  %v831_v4 = vand.u32 2147483647, %v731_v29  ;;  %v624_v14 = vld [vmem:[%s3770_s19 + $0x180] sm:$0xff] }
 0x202   : > { %v725_v25 = vsub.f32 %v615_v1, %v3829_v43  ;;  %v734_v35 = vsub.f32 %v624_v14, %v3776_v56  ;;  %v1021_v27 = vmax.f32 %v921_v49, 0.0  ;;  %v924_v29 = vsub.f32 1.0, %v824_v52  ;;  %v628_v1 = vld [vmem:[%s3770_s19 + $0x1a0] sm:$0xff]  ;;  %v622_v49 = vld [vmem:[%s3770_s19 + $0x170] sm:$0xff] }
 0x203   : > { %2404 = vmatmul.f32.gmra.mxu0 %v1978_v44  ;;  %v1020_v44 = vmax.f32 %v920_v63, 0.0  ;;  %v931_v8 = vsub.f32 1.0, %v831_v4  ;;  %v828_v4 = vand.u32 2147483647, %v728_v30  ;;  %v935_v14 = vsub.f32 1.0, %v835_v17 }
 0x204   : > { %v1787_v24 = vpop.f32.mrf.mxu3  ;;  %v738_v37 = vsub.f32 %v628_v1, %v3776_v56 }
 0x205   : > { %v3973_v19 = vadd.f32 %v1787_v24, %v1714_v11  ;;  %2871 = vmatmul.msk.f32.gmra.mxu2 %vm2110_vm1, %v1979_v31  ;;  %v1026_v11 = vmax.f32 %v926_v5, 0.0  ;;  %v4388_v31 = vld [vmem:[#allocation3_spill] sm:$0xff]  ;;  %v825_v24 = vand.u32 2147483647, %v725_v25  ;;  %v1986_v55 = vmul.f32 %v4389_v26, %v1020_v44  ;;  %v4390_v25 = vld [vmem:[#allocation4_spill] sm:$0xff]  ;;  %v4391_v44 = vld [vmem:[#allocation5_spill] sm:$0xff] }
 0x206   : > { %v1716_v57 = vpop.f32.mrf.mxu1  ;;  %v1993_v32 = vmul.f32 %v4388_v31, %v1027_v22  ;;  %v1031_v2 = vmax.f32 %v931_v8, 0.0  ;;  %v829_v8 = vand.u32 2147483647, %v729_v3  ;;  %v732_v31 = vsub.f32 %v622_v49, %v3818_v60  ;;  %v632_v26 = vld [vmem:[%s3770_s19 + $0x1c0] sm:$0xff]  ;;  %v626_v3 = vld [vmem:[%s3770_s19 + $0x190] sm:$0xff] }
 0x207   : > { %v1992_v6 = vmul.f32 %v4387_v36, %v1026_v11  ;;  %v925_v63 = vsub.f32 1.0, %v825_v24  ;;  %v838_v24 = vand.u32 2147483647, %v738_v37 }
 0x208   : > { %v1928_v16 = vpop.f32.mrf.mxu2  ;;  %v1857_v62 = vpop.f32.mrf.mxu0  ;;  %v1997_v52 = vmul.f32 %v4391_v44, %v1031_v2  ;;  %v929_v30 = vsub.f32 1.0, %v829_v8  ;;  %v832_v2 = vand.u32 2147483647, %v732_v31 }
 0x209   : > { %2229 = vmatmul.f32.gmra.mxu1 %v1988_v61  ;;  %2321 = vmatmul.f32.gmra.mxu3 %v1989_v18  ;;  %v3984_v10 = vadd.f32 %v1928_v16, %v1855_v0  ;;  %v930_v0 = vsub.f32 1.0, %v830_v21  ;;  %v834_v18 = vand.u32 2147483647, %v734_v35  ;;  %v629_v16 = vld [vmem:[%s3770_s19 + $0x1a8] sm:$0xff]  ;;  %v1024_v21 = vmax.f32 %v924_v29, 0.0  ;;  %v623_v35 = vld [vmem:[%s3770_s19 + $0x178] sm:$0xff] }
 0x20a   : > { %v932_v44 = vsub.f32 1.0, %v832_v2 }
 0x20b   : > { %2407 = vmatmul.f32.gmra.mxu0 %v1982_v46  ;;  %v1030_v61 = vmax.f32 %v930_v0, 0.0  ;;  %v1987_v46 = vmul.f32 %v3850_v51, %v1021_v27  ;;  %v1025_v0 = vmax.f32 %v925_v63, 0.0 }
 0x20c   : > { %v1789_v58 = vpop.f32.mrf.mxu3 }
 0x20d   : > { %v3990_v28 = vadd.f32 %v1789_v58, %v1716_v57  ;;  %2872 = vmatmul.msk.f32.gmra.mxu2 %vm2110_vm1, %v1983_v9  ;;  %v739_v9 = vsub.f32 %v629_v16, %v3779_v34  ;;  %v1996_v58 = vmul.f32 %v4390_v25, %v1030_v61  ;;  %v1991_v29 = vmul.f32 %v3865_v7, %v1025_v0  ;;  %v4395_v25 = vld [vmem:[#allocation34_spill] sm:$0xff] }
 0x20e   : > { %v1719_v53 = vpop.f32.mrf.mxu1  ;;  %v733_v61 = vsub.f32 %v623_v35, %v3829_v43 }
 0x20f   : > { %v839_v47 = vand.u32 2147483647, %v739_v9  ;;  %v627_v9 = vld [vmem:[%s3770_s19 + $0x198] sm:$0xff] }
 0x210   : > { %v1930_v15 = vpop.f32.mrf.mxu2  ;;  %v1860_v5 = vpop.f32.mrf.mxu0  ;;  %v833_v37 = vand.u32 2147483647, %v733_v61 }
 0x211   : > { %2232 = vmatmul.f32.gmra.mxu1 %v1992_v6  ;;  %2324 = vmatmul.f32.gmra.mxu3 %v1993_v32  ;;  %v4001_v57 = vadd.f32 %v1930_v15, %v1857_v62  ;;  %v934_v62 = vsub.f32 1.0, %v834_v18  ;;  %v928_v6 = vsub.f32 1.0, %v828_v4  ;;  %v1035_v15 = vmax.f32 %v935_v14, 0.0  ;;  %v4394_v4 = vld [vmem:[#allocation7_spill] sm:$0xff] }
 0x212   : > { %v939_v16 = vsub.f32 1.0, %v839_v47  ;;  %v1029_v14 = vmax.f32 %v929_v30, 0.0 }
 0x213   : > { %2410 = vmatmul.f32.gmra.mxu0 %v1986_v55  ;;  %v1034_v27 = vmax.f32 %v934_v62, 0.0  ;;  %v633_v55 = vld [vmem:[%s3770_s19 + $0x1c8] sm:$0xff]  ;;  %v1028_v17 = vmax.f32 %v928_v6, 0.0  ;;  %v2001_v62 = vmul.f32 %v4394_v4, %v1035_v15  ;;  %v1032_v15 = vmax.f32 %v932_v44, 0.0 }
 0x214   : > { %v1792_v11 = vpop.f32.mrf.mxu3  ;;  %v743_v63 = vsub.f32 %v633_v55, %v3779_v34  ;;  %v637_v6 = vld [vmem:[%s3770_s19 + $0x1e8] sm:$0xff]  ;;  %v1995_v31 = vmul.f32 %v3882_v13, %v1029_v14 }
 0x215   : > { %v4007_v22 = vadd.f32 %v1792_v11, %v1719_v53  ;;  %2873 = vmatmul.msk.f32.gmra.mxu2 %vm2110_vm1, %v1987_v46  ;;  %v4392_v53 = vld [vmem:[#allocation33_spill] sm:$0xff]  ;;  %v742_v46 = vsub.f32 %v632_v26, %v3776_v56  ;;  %v4393_v11 = vld [vmem:[#allocation6_spill] sm:$0xff]  ;;  %v747_v61 = vsub.f32 %v637_v6, %v3779_v34  ;;  %v641_v44 = vld [vmem:[%s3770_s19 + $0x208] sm:$0xff] }
 0x216   : > { %v1721_v51 = vpop.f32.mrf.mxu1  ;;  %v1990_v36 = vmul.f32 %v4392_v53, %v1024_v21  ;;  %v2000_v21 = vmul.f32 %v4393_v11, %v1034_v27  ;;  %v1039_v53 = vmax.f32 %v939_v16, 0.0  ;;  %v933_v27 = vsub.f32 1.0, %v833_v37 }
 0x217   : > { %v842_v35 = vand.u32 2147483647, %v742_v46 }
 0x218   : > { %v1933_v50 = vpop.f32.mrf.mxu2  ;;  %v1862_v40 = vpop.f32.mrf.mxu0  ;;  %v1033_v46 = vmax.f32 %v933_v27, 0.0  ;;  %v751_v27 = vsub.f32 %v641_v44, %v3779_v34 }
 0x219   : > { %2235 = vmatmul.f32.gmra.mxu1 %v1996_v58  ;;  %2327 = vmatmul.f32.gmra.mxu3 %v1997_v52  ;;  %v4018_v32 = vadd.f32 %v1933_v50, %v1860_v5  ;;  %v938_v5 = vsub.f32 1.0, %v838_v24  ;;  %v1994_v58 = vmul.f32 %v4395_v25, %v1028_v17  ;;  %v736_v52 = vsub.f32 %v626_v3, %v3818_v60  ;;  %v4396_v17 = vld [vmem:[#allocation8_spill] sm:$0xff]  ;;  %v631_v3 = vld [vmem:[%s3770_s19 + $0x1b8] sm:$0xff] }
 0x21a   : > { %v843_v50 = vand.u32 2147483647, %v743_v63  ;;  %v737_v24 = vsub.f32 %v627_v9, %v3829_v43 }
 0x21b   : > { %2413 = vmatmul.f32.gmra.mxu0 %v1990_v36  ;;  %v1038_v8 = vmax.f32 %v938_v5, 0.0  ;;  %v636_v36 = vld [vmem:[%s3770_s19 + $0x1e0] sm:$0xff]  ;;  %v836_v26 = vand.u32 2147483647, %v736_v52  ;;  %v4397_v5 = vld [vmem:[#allocation9_spill] sm:$0xff]  ;;  %v1999_v52 = vmul.f32 %v3899_v48, %v1033_v46 }
 0x21c   : > { %v1794_v18 = vpop.f32.mrf.mxu3  ;;  %v746_v30 = vsub.f32 %v636_v36, %v3776_v56  ;;  %v2005_v16 = vmul.f32 %v4397_v5, %v1039_v53  ;;  %v837_v63 = vand.u32 2147483647, %v737_v24  ;;  %v634_v24 = vld [vmem:[%s3770_s19 + $0x1d0] sm:$0xff] }
 0x21d   : > { %v4024_v1 = vadd.f32 %v1794_v18, %v1721_v51  ;;  %2874 = vmatmul.msk.f32.gmra.mxu2 %vm2110_vm1, %v1991_v29  ;;  %v943_v29 = vsub.f32 1.0, %v843_v50  ;;  %v630_v18 = vld [vmem:[%s3770_s19 + $0x1b0] sm:$0xff]  ;;  %v2004_v2 = vmul.f32 %v4396_v17, %v1038_v8  ;;  %v936_v4 = vsub.f32 1.0, %v836_v26  ;;  %v4399_v26 = vld [vmem:[#allocation11_spill] sm:$0xff] }
 0x21e   : > { %v1724_v7 = vpop.f32.mrf.mxu1  ;;  %v846_v9 = vand.u32 2147483647, %v746_v30  ;;  %v937_v8 = vsub.f32 1.0, %v837_v63  ;;  %v744_v5 = vsub.f32 %v634_v24, %v3818_v60 }
 0x21f   : > { %v1043_v25 = vmax.f32 %v943_v29, 0.0  ;;  %v1036_v50 = vmax.f32 %v936_v4, 0.0  ;;  %v645_v4 = vld [vmem:[%s3770_s19 + $0x228] sm:$0xff] }
 0x220   : > { %v1935_v49 = vpop.f32.mrf.mxu2  ;;  %v1865_v51 = vpop.f32.mrf.mxu0  ;;  %v1037_v29 = vmax.f32 %v937_v8, 0.0  ;;  %v755_v8 = vsub.f32 %v645_v4, %v3779_v34 }
 0x221   : > { %2238 = vmatmul.f32.gmra.mxu1 %v2000_v21  ;;  %2330 = vmatmul.f32.gmra.mxu3 %v2001_v62  ;;  %v4035_v0 = vadd.f32 %v1935_v49, %v1862_v40  ;;  %v942_v40 = vsub.f32 1.0, %v842_v35  ;;  %v1998_v21 = vmul.f32 %v3855_v45, %v1032_v15  ;;  %v740_v62 = vsub.f32 %v630_v18, %v3818_v60 }
 0x222   : > { %v847_v49 = vand.u32 2147483647, %v747_v61  ;;  %v741_v35 = vsub.f32 %v631_v3, %v3829_v43  ;;  %v635_v61 = vld [vmem:[%s3770_s19 + $0x1d8] sm:$0xff]  ;;  %v2002_v17 = vmul.f32 %v3871_v20, %v1036_v50  ;;  %v851_v3 = vand.u32 2147483647, %v751_v27 }
 0x223   : > { %2416 = vmatmul.f32.gmra.mxu0 %v1994_v58  ;;  %v1042_v37 = vmax.f32 %v942_v40, 0.0  ;;  %v640_v58 = vld [vmem:[%s3770_s19 + $0x200] sm:$0xff]  ;;  %v840_v53 = vand.u32 2147483647, %v740_v62  ;;  %v2009_v40 = vmul.f32 %v4399_v26, %v1043_v25  ;;  %v2003_v62 = vmul.f32 %v3916_v41, %v1037_v29  ;;  %v639_v27 = vld [vmem:[%s3770_s19 + $0x1f8] sm:$0xff] }
 0x224   : > { %v1797_v47 = vpop.f32.mrf.mxu3  ;;  %v947_v6 = vsub.f32 1.0, %v847_v49  ;;  %v841_v30 = vand.u32 2147483647, %v741_v35  ;;  %v844_v25 = vand.u32 2147483647, %v744_v5  ;;  %v951_v44 = vsub.f32 1.0, %v851_v3 }
 0x225   : > { %v4041_v55 = vadd.f32 %v1797_v47, %v1724_v7  ;;  %2875 = vmatmul.msk.f32.gmra.mxu2 %vm2110_vm1, %v1995_v31  ;;  %v750_v31 = vsub.f32 %v640_v58, %v3776_v56  ;;  %v4398_v47 = vld [vmem:[#allocation10_spill] sm:$0xff]  ;;  %v638_v35 = vld [vmem:[%s3770_s19 + $0x1f0] sm:$0xff] }
 0x226   : > { %v1726_v13 = vpop.f32.mrf.mxu1  ;;  %v2008_v15 = vmul.f32 %v4398_v47, %v1042_v37  ;;  %v941_v37 = vsub.f32 1.0, %v841_v30  ;;  %v748_v26 = vsub.f32 %v638_v35, %v3818_v60 }
 0x227   : > { %v850_v63 = vand.u32 2147483647, %v750_v31 }
 0x228   : > { %v1938_v7 = vpop.f32.mrf.mxu2  ;;  %v1867_v11 = vpop.f32.mrf.mxu0 }
 0x229   : > { %2241 = vmatmul.f32.gmra.mxu1 %v2004_v2  ;;  %2333 = vmatmul.f32.gmra.mxu3 %v2005_v16  ;;  %v4052_v14 = vadd.f32 %v1938_v7, %v1865_v51  ;;  %v946_v51 = vsub.f32 1.0, %v846_v9  ;;  %v940_v2 = vsub.f32 1.0, %v840_v53  ;;  %v1047_v7 = vmax.f32 %v947_v6, 0.0  ;;  %v4401_v53 = vld [vmem:[#allocation13_spill] sm:$0xff] }
 0x22a   : > { %v745_v9 = vsub.f32 %v635_v61, %v3829_v43  ;;  %v1041_v6 = vmax.f32 %v941_v37, 0.0  ;;  %v855_v61 = vand.u32 2147483647, %v755_v8  ;;  %v642_v37 = vld [vmem:[%s3770_s19 + $0x210] sm:$0xff] }
 0x22b   : > { %2419 = vmatmul.f32.gmra.mxu0 %v1998_v21  ;;  %v1046_v46 = vmax.f32 %v946_v51, 0.0  ;;  %v644_v21 = vld [vmem:[%s3770_s19 + $0x220] sm:$0xff]  ;;  %v1040_v49 = vmax.f32 %v940_v2, 0.0  ;;  %v2013_v51 = vmul.f32 %v4401_v53, %v1047_v7  ;;  %v649_v2 = vld [vmem:[%s3770_s19 + $0x248] sm:$0xff]  ;;  %v848_v7 = vand.u32 2147483647, %v748_v26 }
 0x22c   : > { %v1799_v45 = vpop.f32.mrf.mxu3  ;;  %v845_v31 = vand.u32 2147483647, %v745_v9  ;;  %v2007_v5 = vmul.f32 %v3933_v33, %v1041_v6  ;;  %v4402_v33 = vld [vmem:[#allocation14_spill] sm:$0xff] }
 0x22d   : > { %v4058_v36 = vadd.f32 %v1799_v45, %v1726_v13  ;;  %2876 = vmatmul.msk.f32.gmra.mxu2 %vm2110_vm1, %v1999_v52  ;;  %v754_v52 = vsub.f32 %v644_v21, %v3776_v56  ;;  %v4400_v45 = vld [vmem:[#allocation12_spill] sm:$0xff]  ;;  %v2006_v47 = vmul.f32 %v3888_v54, %v1040_v49  ;;  %v955_v21 = vsub.f32 1.0, %v855_v61  ;;  %v4403_v49 = vld [vmem:[#allocation15_spill] sm:$0xff] }
 0x22e   : > { %v1729_v48 = vpop.f32.mrf.mxu1  ;;  %v2012_v50 = vmul.f32 %v4400_v45, %v1046_v46  ;;  %v945_v46 = vsub.f32 1.0, %v845_v31  ;;  %v948_v45 = vsub.f32 1.0, %v848_v7 }
 0x22f   : > { %v854_v30 = vand.u32 2147483647, %v754_v52  ;;  %v643_v52 = vld [vmem:[%s3770_s19 + $0x218] sm:$0xff] }
 0x230   : > { %v1940_v18 = vpop.f32.mrf.mxu2  ;;  %v1870_v13 = vpop.f32.mrf.mxu0 }
 0x231   : > { %2244 = vmatmul.f32.gmra.mxu1 %v2008_v15  ;;  %2336 = vmatmul.f32.gmra.mxu3 %v2009_v40  ;;  %v4069_v16 = vadd.f32 %v1940_v18, %v1867_v11  ;;  %v950_v11 = vsub.f32 1.0, %v850_v63  ;;  %v944_v15 = vsub.f32 1.0, %v844_v25  ;;  %v1051_v18 = vmax.f32 %v951_v44, 0.0 }
 0x232   : > { %v749_v63 = vsub.f32 %v639_v27, %v3829_v43  ;;  %v1055_v27 = vmax.f32 %v955_v21, 0.0  ;;  %v647_v21 = vld [vmem:[%s3770_s19 + $0x238] sm:$0xff] }
 0x233   : > { %2422 = vmatmul.f32.gmra.mxu0 %v2002_v17  ;;  %v1050_v29 = vmax.f32 %v950_v11, 0.0  ;;  %v648_v17 = vld [vmem:[%s3770_s19 + $0x240] sm:$0xff]  ;;  %v1044_v3 = vmax.f32 %v944_v15, 0.0  ;;  %v2017_v25 = vmul.f32 %v4403_v49, %v1051_v18  ;;  %v1045_v11 = vmax.f32 %v945_v46, 0.0 }
 0x234   : > { %v1802_v20 = vpop.f32.mrf.mxu3  ;;  %v758_v4 = vsub.f32 %v648_v17, %v3776_v56  ;;  %v849_v44 = vand.u32 2147483647, %v749_v63 }
 0x235   : > { %v4075_v58 = vadd.f32 %v1802_v20, %v1729_v48  ;;  %2877 = vmatmul.msk.f32.gmra.mxu2 %vm2110_vm1, %v2003_v62  ;;  %v759_v62 = vsub.f32 %v649_v2, %v3779_v34  ;;  %v2016_v20 = vmul.f32 %v4402_v33, %v1050_v29  ;;  %v2011_v15 = vmul.f32 %v3950_v59, %v1045_v11  ;;  %v4404_v59 = vld [vmem:[#allocation16_spill] sm:$0xff] }
 0x236   : > { %v1731_v41 = vpop.f32.mrf.mxu1  ;;  %v858_v6 = vand.u32 2147483647, %v758_v4  ;;  %v949_v26 = vsub.f32 1.0, %v849_v44  ;;  %v753_v29 = vsub.f32 %v643_v52, %v3829_v43  ;;  %v656_v44 = vld [vmem:[%s3770_s19 + $0x280] sm:$0xff] }
 0x237   : > { %v2010_v41 = vmul.f32 %v3905_v39, %v1044_v3  ;;  %v859_v31 = vand.u32 2147483647, %v759_v62 }
 0x238   : > { %v1943_v24 = vpop.f32.mrf.mxu2  ;;  %v1872_v48 = vpop.f32.mrf.mxu0  ;;  %v1049_v7 = vmax.f32 %v949_v26, 0.0 }
 0x239   : > { %2247 = vmatmul.f32.gmra.mxu1 %v2012_v50  ;;  %2339 = vmatmul.f32.gmra.mxu3 %v2013_v51  ;;  %v4086_v40 = vadd.f32 %v1943_v24, %v1870_v13  ;;  %v954_v13 = vsub.f32 1.0, %v854_v30  ;;  %v752_v50 = vsub.f32 %v642_v37, %v3818_v60  ;;  %v652_v24 = vld [vmem:[%s3770_s19 + $0x260] sm:$0xff]  ;;  %v1048_v30 = vmax.f32 %v948_v45, 0.0 }
 0x23a   : > { %v959_v18 = vsub.f32 1.0, %v859_v31  ;;  %v762_v17 = vsub.f32 %v652_v24, %v3776_v56 }
 0x23b   : > { %2425 = vmatmul.f32.gmra.mxu0 %v2006_v47  ;;  %v1054_v51 = vmax.f32 %v954_v13, 0.0  ;;  %v653_v47 = vld [vmem:[%s3770_s19 + $0x268] sm:$0xff]  ;;  %v852_v61 = vand.u32 2147483647, %v752_v50  ;;  %v853_v13 = vand.u32 2147483647, %v753_v29  ;;  %v2014_v37 = vmul.f32 %v3922_v12, %v1048_v30 }
 0x23c   : > { %v1804_v54 = vpop.f32.mrf.mxu3  ;;  %v763_v2 = vsub.f32 %v653_v47, %v3779_v34  ;;  %v1059_v52 = vmax.f32 %v959_v18, 0.0  ;;  %v757_v50 = vsub.f32 %v647_v21, %v3829_v43  ;;  %v4407_v30 = vld [vmem:[#allocation19_spill] sm:$0xff] }
 0x23d   : > { %2878 = vmatmul.msk.f32.gmra.mxu2 %vm2110_vm1, %v2007_v5  ;;  %v646_v5 = vld [vmem:[%s3770_s19 + $0x230] sm:$0xff]  ;;  %v2020_v63 = vmul.f32 %v4404_v59, %v1054_v51  ;;  %v4405_v54 = vld [vmem:[#allocation17_spill] sm:$0xff]  ;;  %v952_v33 = vsub.f32 1.0, %v852_v61  ;;  %v953_v45 = vsub.f32 1.0, %v853_v13  ;;  %v766_v51 = vsub.f32 %v656_v44, %v3776_v56 }
 0x23e   : > { %v4096_v9 = vpop.f32.mrf.mxu1  ;;  %v2021_v3 = vmul.f32 %v4405_v54, %v1055_v27  ;;  %v863_v11 = vand.u32 2147483647, %v763_v2  ;;  %v2025_v61 = vmul.f32 %v4407_v30, %v1059_v52  ;;  %v857_v18 = vand.u32 2147483647, %v757_v50  ;;  %v651_v2 = vld [vmem:[%s3770_s19 + $0x258] sm:$0xff] }
 0x240   : > { %v1945_v8 = vpop.f32.mrf.mxu2  ;;  %v4101_v35 = vpop.f32.mrf.mxu0  ;;  %v963_v24 = vsub.f32 1.0, %v863_v11 }
 0x241   : > { %2250 = vmatmul.f32.gmra.mxu1 %v2016_v20  ;;  %2342 = vmatmul.f32.gmra.mxu3 %v2017_v25  ;;  %v4105_v53 = vadd.f32 %v1945_v8, %v1872_v48  ;;  %v958_v48 = vsub.f32 1.0, %v858_v6  ;;  %v756_v20 = vsub.f32 %v646_v5, %v3818_v60  ;;  %v862_v25 = vand.u32 2147483647, %v762_v17  ;;  %v657_v8 = vld [vmem:[%s3770_s19 + $0x288] sm:$0xff]  ;;  %v4143_v17 = vld [vmem:[%s4352_s6] ss:$0 sm:$0xff] }
 0x242   : > { %v1052_v6 = vmax.f32 %v952_v33, 0.0  ;;  %v767_v47 = vsub.f32 %v657_v8, %v3779_v34  ;;  %v1063_v21 = vmax.f32 %v963_v24, 0.0  ;;  %v661_v33 = vld [vmem:[%s3770_s19 + $0x2a8] sm:$0xff] }
 0x243   : > { %2428 = vmatmul.f32.gmra.mxu0 %v2010_v41  ;;  %v1058_v49 = vmax.f32 %v958_v48, 0.0  ;;  %v2015_v41 = vmul.f32 %v3967_v38, %v1049_v7  ;;  %v856_v31 = vand.u32 2147483647, %v756_v20  ;;  %v962_v27 = vsub.f32 1.0, %v862_v25  ;;  %v4406_v38 = vld [vmem:[#allocation18_spill] sm:$0xff] }
 0x244   : > { %v4111_v39 = vpop.f32.mrf.mxu3  ;;  %v1053_v48 = vmax.f32 %v953_v45, 0.0  ;;  %v2018_v54 = vmul.f32 %v3939_v42, %v1052_v6  ;;  %v761_v25 = vsub.f32 %v651_v2, %v3829_v43  ;;  %v2204_v42 = vadd.f32 %v4143_v17, %v4096_v9  ;;  %v654_v6 = vld [vmem:[%s3770_s19 + $0x270] sm:$0xff] }
 0x245   : > { %2879 = vmatmul.msk.f32.gmra.mxu2 %vm2110_vm1, %v2011_v15  ;;  %v650_v15 = vld [vmem:[%s3770_s19 + $0x250] sm:$0xff]  ;;  %v2024_v29 = vmul.f32 %v4406_v38, %v1058_v49  ;;  %v1062_v13 = vmax.f32 %v962_v27, 0.0  ;;  %v957_v49 = vsub.f32 1.0, %v857_v18  ;;  %v771_v9 = vsub.f32 %v661_v33, %v3779_v34  ;;  %v4409_v27 = vld [vmem:[#allocation21_spill] sm:$0xff] }
 0x246   : > { %v4117_v46 = vpop.f32.mrf.mxu1  ;;  %v760_v7 = vsub.f32 %v650_v15, %v3818_v60  ;;  %v2019_v20 = vmul.f32 %v3984_v10, %v1053_v48  ;;  %v4408_v10 = vld [vmem:[#allocation20_spill] sm:$0xff]  ;;  %v2029_v24 = vmul.f32 %v4409_v27, %v1063_v21  ;;  %v861_v15 = vand.u32 2147483647, %v761_v25 }
 0x247   : > { %v2028_v45 = vmul.f32 %v4408_v10, %v1062_v13  ;;  %v764_v2 = vsub.f32 %v654_v6, %v3818_v60  ;;  %v4411_v10 = vld [vmem:[#allocation23_spill] sm:$0xff] }
 0x248   : > { %v4122_v4 = vpop.f32.mrf.mxu2  ;;  %v1877_v62 = vpop.f32.mrf.mxu0  ;;  %v860_v8 = vand.u32 2147483647, %v760_v7  ;;  %v665_v7 = vld [vmem:[%s3770_s19 + $0x2c8] sm:$0xff]  ;;  %v961_v21 = vsub.f32 1.0, %v861_v15 }
 0x249   : > { %2253 = vmatmul.f32.gmra.mxu1 %v2020_v63  ;;  %2345 = vmatmul.f32.gmra.mxu3 %v2021_v3  ;;  %v866_v63 = vand.u32 2147483647, %v766_v51  ;;  %v956_v3 = vsub.f32 1.0, %v856_v31  ;;  %v867_v62 = vand.u32 2147483647, %v767_v47  ;;  %v1057_v47 = vmax.f32 %v957_v49, 0.0 }
 0x24a   : > { %v960_v18 = vsub.f32 1.0, %v860_v8  ;;  %v864_v49 = vand.u32 2147483647, %v764_v2  ;;  %v658_v8 = vld [vmem:[%s3770_s19 + $0x290] sm:$0xff]  ;;  %v669_v2 = vld [vmem:[%s3770_s19 + $0x2e8] sm:$0xff] }
 0x24b   : > { %2431 = vmatmul.f32.gmra.mxu0 %v2014_v37  ;;  %v660_v37 = vld [vmem:[%s3770_s19 + $0x2a0] sm:$0xff]  ;;  %v966_v44 = vsub.f32 1.0, %v866_v63  ;;  %v1056_v52 = vmax.f32 %v956_v3, 0.0  ;;  %v967_v50 = vsub.f32 1.0, %v867_v62  ;;  %v871_v3 = vand.u32 2147483647, %v771_v9 }
 0x24c   : > { %v4130_v12 = vpop.f32.mrf.mxu3  ;;  %v770_v51 = vsub.f32 %v660_v37, %v3776_v56  ;;  %v2023_v13 = vmul.f32 %v4001_v57, %v1057_v47  ;;  %v4410_v57 = vld [vmem:[#allocation22_spill] sm:$0xff]  ;;  %v964_v15 = vsub.f32 1.0, %v864_v49  ;;  %v4413_v49 = vld [vmem:[#allocation25_spill] sm:$0xff] }
 0x24d   : > { %2880 = vmatmul.msk.f32.gmra.mxu2 %vm2110_vm1, %v2015_v41  ;;  %v2296_v41 = vadd.f32 %v4111_v39, %v2204_v42  ;;  %v2022_v48 = vmul.f32 %v3956_v23, %v1056_v52  ;;  %v1067_v63 = vmax.f32 %v967_v50, 0.0  ;;  %v2207_v23 = vadd.f32 %v4143_v17, %v4117_v46 }
 0x24e   : > { %v4136_v26 = vpop.f32.mrf.mxu1  ;;  %v971_v52 = vsub.f32 1.0, %v871_v3  ;;  %v775_v46 = vsub.f32 %v665_v7, %v3779_v34  ;;  %v1061_v50 = vmax.f32 %v961_v21, 0.0  ;;  %v1064_v3 = vmax.f32 %v964_v15, 0.0 }
 0x24f   : > { %v2299_v25 = vadd.f32 %v4130_v12, %v2207_v23  ;;  %v659_v12 = vld [vmem:[%s3770_s19 + $0x298] sm:$0xff] }
 0x250   : > { %v1950_v5 = vpop.f32.mrf.mxu2  ;;  %v2387_v59 = vpop.f32.mrf.mxu0 }
 0x251   : > { %2256 = vmatmul.f32.gmra.mxu1 %v2024_v29  ;;  %2348 = vmatmul.f32.gmra.mxu3 %v2025_v61  ;;  %v2388_v38 = vadd.f32 %v2387_v59, %v2296_v41  ;;  %v655_v29 = vld [vmem:[%s3770_s19 + $0x278] sm:$0xff]  ;;  %v664_v61 = vld [vmem:[%s3770_s19 + $0x2c0] sm:$0xff]  ;;  %v1066_v59 = vmax.f32 %v966_v44, 0.0 }
 0x252   : > { %v765_v62 = vsub.f32 %v655_v29, %v3829_v43  ;;  %v774_v37 = vsub.f32 %v664_v61, %v3776_v56  ;;  %v1071_v61 = vmax.f32 %v971_v52, 0.0  ;;  %v663_v52 = vld [vmem:[%s3770_s19 + $0x2b8] sm:$0xff] }
 0x253   : > { %2434 = vmatmul.f32.gmra.mxu0 %v2018_v54  ;;  %v870_v54 = vand.u32 2147483647, %v770_v51  ;;  %v2032_v42 = vmul.f32 %v4410_v57, %v1066_v59  ;;  %v769_v59 = vsub.f32 %v659_v12, %v3829_v43 }
 0x254   : > { %v4154_v11 = vpop.f32.mrf.mxu3  ;;  %v865_v51 = vand.u32 2147483647, %v765_v62  ;;  %v874_v6 = vand.u32 2147483647, %v774_v37  ;;  %v662_v37 = vld [vmem:[%s3770_s19 + $0x2b0] sm:$0xff] }
 0x255   : > { %2881 = vmatmul.msk.f32.gmra.mxu2 %vm2110_vm1, %v2019_v20  ;;  %v1060_v20 = vmax.f32 %v960_v18, 0.0  ;;  %v970_v44 = vsub.f32 1.0, %v870_v54  ;;  %v668_v18 = vld [vmem:[%s3770_s19 + $0x2e0] sm:$0xff] }
 0x256   : > { %v4163_v31 = vpop.f32.mrf.mxu1  ;;  %v974_v54 = vsub.f32 1.0, %v874_v6  ;;  %v778_v23 = vsub.f32 %v668_v18, %v3776_v56 }
 0x257   : > { %v2026_v47 = vmul.f32 %v3973_v19, %v1060_v20  ;;  %v2210_v19 = vadd.f32 %v4143_v17, %v4136_v26  ;;  %v779_v26 = vsub.f32 %v669_v2, %v3779_v34 }
 0x258   : > { %v2479_v39 = vpop.f32.mrf.mxu2  ;;  %v2390_v30 = vpop.f32.mrf.mxu0  ;;  %v878_v12 = vand.u32 2147483647, %v778_v23 }
 0x259   : > { %2259 = vmatmul.f32.gmra.mxu1 %v2028_v45  ;;  %2351 = vmatmul.f32.gmra.mxu3 %v2029_v24  ;;  %v2480_v5 = vadd.f32 %v2479_v39, %v2388_v38  ;;  %v2033_v45 = vmul.f32 %v4411_v10, %v1067_v63  ;;  %v2391_v9 = vadd.f32 %v2390_v30, %v2299_v25  ;;  %v1070_v39 = vmax.f32 %v970_v44, 0.0 }
 0x25a   : > { %v768_v38 = vsub.f32 %v658_v8, %v3818_v60  ;;  %v2027_v30 = vmul.f32 %v4018_v32, %v1061_v50  ;;  %v4412_v32 = vld [vmem:[#allocation24_spill] sm:$0xff]  ;;  %v2037_v25 = vmul.f32 %v4413_v49, %v1071_v61  ;;  %v672_v8 = vld [vmem:[%s3770_s19 + $0x300] sm:$0xf]  ;;  %v2030_v10 = vmul.f32 %v3990_v28, %v1064_v3 }
 0x25b   : > { %2555 = vst.msk [vmem:[%s4170_s28] sm:$0xff] %vm2554_vm2, %v2480_v5  ;;  %2437 = vmatmul.f32.gmra.mxu0 %v2022_v48  ;;  %v875_v48 = vand.u32 2147483647, %v775_v46  ;;  %v965_v5 = vsub.f32 1.0, %v865_v51  ;;  %v2036_v21 = vmul.f32 %v4412_v32, %v1070_v39  ;;  %v772_v50 = vsub.f32 %v662_v37, %v3818_v60 }
 0x25c   : > { %v4183_v33 = vpop.f32.mrf.mxu3  ;;  %v868_v7 = vand.u32 2147483647, %v768_v38  ;;  %v773_v38 = vsub.f32 %v663_v52, %v3829_v43  ;;  %v2213_v28 = vadd.f32 %v4143_v17, %v4163_v31  ;;  %v674_v52 = vld [vmem:[%s3770_s19 + $0x310] sm:$0xf] }
 0x25d   : > { %2882 = vmatmul.msk.f32.gmra.mxu2 %vm2110_vm1, %v2023_v13  ;;  %v2302_v13 = vadd.f32 %v4154_v11, %v2210_v19  ;;  %v975_v62 = vsub.f32 1.0, %v875_v48  ;;  %v1065_v57 = vmax.f32 %v965_v5, 0.0  ;;  %v872_v48 = vand.u32 2147483647, %v772_v50 }
 0x25e   : > { %v4190_v41 = vpop.f32.mrf.mxu1  ;;  %v2305_v18 = vadd.f32 %v4183_v33, %v2213_v28  ;;  %v671_v28 = vld [vmem:[%s3770_s19 + $0x2f8] sm:$0xff] }
 0x25f   : > { %v1075_v6 = vmax.f32 %v975_v62, 0.0 }
 0x260   : > { %v2482_v27 = vpop.f32.mrf.mxu2  ;;  %v2393_v24 = vpop.f32.mrf.mxu0 }
 0x261   : > { %2262 = vmatmul.f32.gmra.mxu1 %v2032_v42  ;;  %2354 = vmatmul.f32.gmra.mxu3 %v2033_v45  ;;  %v2483_v29 = vadd.f32 %v2482_v27, %v2391_v9  ;;  %v869_v42 = vand.u32 2147483647, %v769_v59  ;;  %v2394_v44 = vadd.f32 %v2393_v24, %v2302_v13  ;;  %v968_v45 = vsub.f32 1.0, %v868_v7  ;;  %v666_v59 = vld [vmem:[%s3770_s19 + $0x2d0] sm:$0xff] }
 0x262   : > { %v1074_v9 = vmax.f32 %v974_v54, 0.0  ;;  %v879_v27 = vand.u32 2147483647, %v779_v26  ;;  %v2031_v24 = vmul.f32 %v4035_v0, %v1065_v57  ;;  %v4414_v0 = vld [vmem:[#allocation26_spill] sm:$0xff]  ;;  %v4415_v54 = vld [vmem:[#allocation27_spill] sm:$0xff]  ;;  %v972_v26 = vsub.f32 1.0, %v872_v48 }
 0x263   : > { %2556 = vst.msk [vmem:[%s4170_s28 + $0x8] sm:$0xff] %vm2554_vm2, %v2483_v29  ;;  %2440 = vmatmul.f32.gmra.mxu0 %v2026_v47  ;;  %v673_v47 = vld [vmem:[%s3770_s19 + $0x308] sm:$0xf]  ;;  %v969_v15 = vsub.f32 1.0, %v869_v42  ;;  %v782_v29 = vsub.f32 %v672_v8, %v3776_v56  ;;  %v1068_v61 = vmax.f32 %v968_v45, 0.0  ;;  %v2041_v56 = vmul.f32 %v4415_v54, %v1075_v6  ;;  %v4417_v6 = vld [vmem:[#allocation29_spill] sm:$0xff] }
 0x264   : > { %v4204_v63 = vpop.f32.mrf.mxu3  ;;  %v2040_v2 = vmul.f32 %v4414_v0, %v1074_v9  ;;  %v979_v5 = vsub.f32 1.0, %v879_v27  ;;  %v783_v31 = vsub.f32 %v673_v47, %v3779_v34  ;;  %v873_v7 = vand.u32 2147483647, %v773_v38 }
 0x265   : > { %2883 = vmatmul.msk.f32.gmra.mxu2 %vm2110_vm1, %v2027_v30  ;;  %v978_v30 = vsub.f32 1.0, %v878_v12  ;;  %v1069_v3 = vmax.f32 %v969_v15, 0.0  ;;  %v882_v32 = vand.u32 2147483647, %v782_v29  ;;  %v2034_v23 = vmul.f32 %v4007_v22, %v1068_v61 }
 0x266   : > { %v4212_v20 = vpop.f32.mrf.mxu1  ;;  %v776_v34 = vsub.f32 %v666_v59, %v3818_v60  ;;  %v883_v57 = vand.u32 2147483647, %v783_v31  ;;  %v2216_v22 = vadd.f32 %v4143_v17, %v4190_v41  ;;  %v1072_v45 = vmax.f32 %v972_v26, 0.0  ;;  %v670_v41 = vld [vmem:[%s3770_s19 + $0x2f0] sm:$0xff]  ;;  %v4419_v26 = vld [vmem:[#allocation31_spill] sm:$0xff] }
 0x267   : > { %v1078_v49 = vmax.f32 %v978_v30, 0.0  ;;  %v2035_v42 = vmul.f32 %v4052_v14, %v1069_v3  ;;  %v784_v47 = vsub.f32 %v674_v52, %v3818_v60  ;;  %v781_v54 = vsub.f32 %v671_v28, %v3829_v43 }
 0x268   : > { %v2485_v11 = vpop.f32.mrf.mxu2  ;;  %v2396_v46 = vpop.f32.mrf.mxu0  ;;  %v876_v50 = vand.u32 2147483647, %v776_v34  ;;  %v2308_v14 = vadd.f32 %v4204_v63, %v2216_v22  ;;  %v983_v27 = vsub.f32 1.0, %v883_v57 }
 0x269   : > { %2265 = vmatmul.f32.gmra.mxu1 %v2036_v21  ;;  %2357 = vmatmul.f32.gmra.mxu3 %v2037_v25  ;;  %v2486_v51 = vadd.f32 %v2485_v11, %v2394_v44  ;;  %v2397_v13 = vadd.f32 %v2396_v46, %v2305_v18  ;;  %v667_v21 = vld [vmem:[%s3770_s19 + $0x2d8] sm:$0xff]  ;;  %v1079_v25 = vmax.f32 %v979_v5, 0.0  ;;  %v973_v44 = vsub.f32 1.0, %v873_v7 }
 0x26a   : > { %v777_v11 = vsub.f32 %v667_v21, %v3829_v43  ;;  %v675_v46 = vld [vmem:[%s3770_s19 + $0x318] sm:$0xf]  ;;  %v2038_v18 = vmul.f32 %v4024_v1, %v1072_v45  ;;  %v976_v0 = vsub.f32 1.0, %v876_v50  ;;  %v1083_v31 = vmax.f32 %v983_v27, 0.0 }
 0x26b   : > { %2557 = vst.msk [vmem:[%s4170_s28 + $0x10] sm:$0xff] %vm2554_vm2, %v2486_v51  ;;  %2443 = vmatmul.f32.gmra.mxu0 %v2030_v10  ;;  %v982_v10 = vsub.f32 1.0, %v882_v32  ;;  %v4416_v51 = vld [vmem:[#allocation28_spill] sm:$0xff]  ;;  %v2045_v12 = vmul.f32 %v4417_v6, %v1079_v25  ;;  %v1073_v15 = vmax.f32 %v973_v44, 0.0  ;;  %v785_v29 = vsub.f32 %v675_v46, %v3829_v43 }
 0x26c   : > { %v4227_v39 = vpop.f32.mrf.mxu3  ;;  %v2044_v9 = vmul.f32 %v4416_v51, %v1078_v49  ;;  %v877_v38 = vand.u32 2147483647, %v777_v11  ;;  %v884_v59 = vand.u32 2147483647, %v784_v47  ;;  %v2049_v34 = vmul.f32 %v4419_v26, %v1083_v31 }
 0x26d   : > { %2884 = vmatmul.msk.f32.gmra.mxu2 %vm2110_vm1, %v2031_v24  ;;  %v1082_v5 = vmax.f32 %v982_v10, 0.0  ;;  %v885_v7 = vand.u32 2147483647, %v785_v29  ;;  %v1949_v10 = vadd.f32 %v4122_v4, %v4101_v35 }
 0x26e   : > { %v4234_v19 = vpop.f32.mrf.mxu1  ;;  %v977_v3 = vsub.f32 1.0, %v877_v38  ;;  %v984_v43 = vsub.f32 1.0, %v884_v59 }
 0x26f   : > { %v2222_v45 = vadd.f32 %v4143_v17, %v4234_v19 }
 0x270   : > { %v2488_v33 = vpop.f32.mrf.mxu2  ;;  %v2399_v62 = vpop.f32.mrf.mxu0  ;;  %v1084_v52 = vmax.f32 %v984_v43, 0.0 }
 0x271   : > { %2268 = vmatmul.f32.gmra.mxu1 %v2040_v2  ;;  %2360 = vmatmul.f32.gmra.mxu3 %v2041_v56  ;;  %v2489_v37 = vadd.f32 %v2488_v33, %v2397_v13  ;;  %v2400_v61 = vadd.f32 %v2399_v62, %v2308_v14  ;;  %v780_v2 = vsub.f32 %v670_v41, %v3818_v60  ;;  %v1076_v60 = vmax.f32 %v976_v0, 0.0  ;;  %v4418_v33 = vld [vmem:[#allocation30_spill] sm:$0xff] }
 0x272   : > { %v2039_v56 = vmul.f32 %v4069_v16, %v1073_v15  ;;  %v2219_v13 = vadd.f32 %v4143_v17, %v4212_v20  ;;  %v2048_v62 = vmul.f32 %v4418_v33, %v1082_v5  ;;  %v985_v20 = vsub.f32 1.0, %v885_v7 }
 0x273   : > { %2558 = vst.msk [vmem:[%s4170_s28 + $0x18] sm:$0xff] %vm2554_vm2, %v2489_v37  ;;  %2446 = vmatmul.f32.gmra.mxu0 %v2034_v23  ;;  %v880_v32 = vand.u32 2147483647, %v780_v2  ;;  %v881_v23 = vand.u32 2147483647, %v781_v54  ;;  %v1077_v37 = vmax.f32 %v977_v3, 0.0 }
 0x274   : > { %v4248_v8 = vpop.f32.mrf.mxu3  ;;  %v2311_v21 = vadd.f32 %v4227_v39, %v2219_v13  ;;  %v1085_v46 = vmax.f32 %v985_v20, 0.0 }
 0x275   : > { %2885 = vmatmul.msk.f32.gmra.mxu2 %vm2110_vm1, %v2035_v42  ;;  %v2042_v42 = vmul.f32 %v4041_v55, %v1076_v60  ;;  %v980_v44 = vsub.f32 1.0, %v880_v32  ;;  %v981_v11 = vsub.f32 1.0, %v881_v23  ;;  %v2043_v22 = vmul.f32 %v4086_v40, %v1077_v37 }
 0x276   : > { %v4256_v24 = vpop.f32.mrf.mxu1  ;;  %v2314_v14 = vadd.f32 %v4248_v8, %v2222_v45  ;;  %v2050_v40 = vmul.f32 %v4075_v58, %v1084_v52  ;;  %v2051_v6 = vmul.f32 %v1949_v10, %v1085_v46 }
 0x277   : > { %v1080_v55 = vmax.f32 %v980_v44, 0.0  ;;  %v2225_v8 = vadd.f32 %v4143_v17, %v4256_v24 }
 0x278   : > { %v2491_v48 = vpop.f32.mrf.mxu2  ;;  %v2402_v63 = vpop.f32.mrf.mxu0 }
 0x279   : > { %2271 = vmatmul.f32.gmra.mxu1 %v2044_v9  ;;  %2363 = vmatmul.f32.gmra.mxu3 %v2045_v12  ;;  %v2492_v30 = vadd.f32 %v2491_v48, %v2400_v61  ;;  %v2403_v49 = vadd.f32 %v2402_v63, %v2311_v21  ;;  %v1081_v9 = vmax.f32 %v981_v11, 0.0  ;;  %v2046_v19 = vmul.f32 %v4058_v36, %v1080_v55 }
 0x27b   : > { %2559 = vst.msk [vmem:[%s4170_s28 + $0x20] sm:$0xff] %vm2554_vm2, %v2492_v30  ;;  %2449 = vmatmul.f32.gmra.mxu0 %v2038_v18  ;;  %v2047_v41 = vmul.f32 %v4105_v53, %v1081_v9 }
 0x27c   : > { %v2316_v1 = vpop.f32.mrf.mxu3 }
 0x27d   : > { %2886 = vmatmul.msk.f32.gmra.mxu2 %vm2110_vm1, %v2039_v56  ;;  %v2317_v47 = vadd.f32 %v2316_v1, %v2225_v8 }
 0x27e   : > { %v2227_v16 = vpop.f32.mrf.mxu1 }
 0x27f   : > { %v2228_v61 = vadd.f32 %v4143_v17, %v2227_v16 }
 0x280   : > { %v2494_v25 = vpop.f32.mrf.mxu2  ;;  %v2405_v57 = vpop.f32.mrf.mxu0 }
 0x281   : > { %2274 = vmatmul.f32.gmra.mxu1 %v2048_v62  ;;  %2366 = vmatmul.f32.gmra.mxu3 %v2049_v34  ;;  %v2495_v39 = vadd.f32 %v2494_v25, %v2403_v49  ;;  %v2406_v12 = vadd.f32 %v2405_v57, %v2314_v14 }
 0x283   : > { %2560 = vst.msk [vmem:[%s4170_s28 + $0x28] sm:$0xff] %vm2554_vm2, %v2495_v39  ;;  %2452 = vmatmul.f32.gmra.mxu0 %v2042_v42 }
 0x284   : > { %v2319_v50 = vpop.f32.mrf.mxu3 }
 0x285   : > { %2887 = vmatmul.msk.f32.gmra.mxu2 %vm2110_vm1, %v2043_v22  ;;  %v2320_v48 = vadd.f32 %v2319_v50, %v2228_v61 }
 0x286   : > { %v2230_v51 = vpop.f32.mrf.mxu1 }
 0x287   : > { %v2231_v30 = vadd.f32 %v4143_v17, %v2230_v51 }
 0x288   : > { %v2497_v35 = vpop.f32.mrf.mxu2  ;;  %v2408_v4 = vpop.f32.mrf.mxu0 }
 0x289   : > { %2458 = vmatmul.f32.vlgmr.msrb.gmra.mxu1 %v2050_v40  ;;  %2889 = vmatmul.msk.f32.vlgmr.msrb.gmra.mxu3 %vm2110_vm1, %v2051_v6  ;;  %v2498_v27 = vadd.f32 %v2497_v35, %v2406_v12  ;;  %v2409_v36 = vadd.f32 %v2408_v4, %v2317_v47 }
 0x28b   : > { %2561 = vst.msk [vmem:[%s4170_s28 + $0x30] sm:$0xff] %vm2554_vm2, %v2498_v27  ;;  %2455 = vmatmul.f32.gmra.mxu0 %v2046_v19 }
 0x28c   : > { %v2322_v58 = vpop.f32.mrf.mxu3 }
 0x28d   : > { %2888 = vmatmul.msk.f32.gmra.mxu2 %vm2110_vm1, %v2047_v41  ;;  %v2323_v31 = vadd.f32 %v2322_v58, %v2231_v30 }
 0x28e   : > { %v2233_v15 = vpop.f32.mrf.mxu1 }
 0x28f   : > { %v2234_v13 = vadd.f32 %v4143_v17, %v2233_v15 }
 0x290   : > { %v2500_v38 = vpop.f32.mrf.mxu2  ;;  %v2411_v28 = vpop.f32.mrf.mxu0 }
 0x291   : > { %v2501_v29 = vadd.f32 %v2500_v38, %v2409_v36  ;;  %v2412_v63 = vadd.f32 %v2411_v28, %v2320_v48 }
 0x293   : > { %2562 = vst.msk [vmem:[%s4170_s28 + $0x38] sm:$0xff] %vm2554_vm2, %v2501_v29 }
 0x294   : > { %v2325_v53 = vpop.f32.mrf.mxu3 }
 0x295   : > { %v2326_v60 = vadd.f32 %v2325_v53, %v2234_v13 }
 0x296   : > { %v2236_v24 = vpop.f32.mrf.mxu1 }
 0x297   : > { %v2237_v23 = vadd.f32 %v4143_v17, %v2236_v24 }
 0x298   : > { %v2503_v18 = vpop.f32.mrf.mxu2  ;;  %v2414_v0 = vpop.f32.mrf.mxu0 }
 0x299   : > { %v2504_v2 = vadd.f32 %v2503_v18, %v2412_v63  ;;  %v2415_v54 = vadd.f32 %v2414_v0, %v2323_v31 }
 0x29b   : > { %2563 = vst.msk [vmem:[%s4170_s28 + $0x40] sm:$0xff] %vm2554_vm2, %v2504_v2 }
 0x29c   : > { %v2328_v5 = vpop.f32.mrf.mxu3 }
 0x29d   : > { %v2329_v26 = vadd.f32 %v2328_v5, %v2237_v23 }
 0x29e   : > { %v2239_v59 = vpop.f32.mrf.mxu1 }
 0x29f   : > { %v2240_v57 = vadd.f32 %v4143_v17, %v2239_v59 }
 0x2a0   : > { %v2506_v56 = vpop.f32.mrf.mxu2  ;;  %v2417_v3 = vpop.f32.mrf.mxu0 }
 0x2a1   : > { %v2507_v7 = vadd.f32 %v2506_v56, %v2415_v54  ;;  %v2418_v21 = vadd.f32 %v2417_v3, %v2326_v60 }
 0x2a3   : > { %2564 = vst.msk [vmem:[%s4170_s28 + $0x48] sm:$0xff] %vm2554_vm2, %v2507_v7 }
 0x2a4   : > { %v2331_v1 = vpop.f32.mrf.mxu3 }
 0x2a5   : > { %v2332_v44 = vadd.f32 %v2331_v1, %v2240_v57 }
 0x2a6   : > { %v2242_v32 = vpop.f32.mrf.mxu1 }
 0x2a7   : > { %v2243_v10 = vadd.f32 %v4143_v17, %v2242_v32 }
 0x2a8   : > { %v2509_v33 = vpop.f32.mrf.mxu2  ;;  %v2420_v62 = vpop.f32.mrf.mxu0 }
 0x2a9   : > { %v2510_v43 = vadd.f32 %v2509_v33, %v2418_v21  ;;  %v2421_v37 = vadd.f32 %v2420_v62, %v2329_v26 }
 0x2ab   : > { %2565 = vst.msk [vmem:[%s4170_s28 + $0x50] sm:$0xff] %vm2554_vm2, %v2510_v43 }
 0x2ac   : > { %v2334_v16 = vpop.f32.mrf.mxu3 }
 0x2ad   : > { %v2335_v50 = vadd.f32 %v2334_v16, %v2243_v10 }
 0x2ae   : > { %v2245_v34 = vpop.f32.mrf.mxu1 }
 0x2af   : > { %v2246_v6 = vadd.f32 %v4143_v17, %v2245_v34 }
 0x2b0   : > { %v2512_v20 = vpop.f32.mrf.mxu2  ;;  %v2423_v49 = vpop.f32.mrf.mxu0 }
 0x2b1   : > { %v2513_v25 = vadd.f32 %v2512_v20, %v2421_v37  ;;  %v2424_v52 = vadd.f32 %v2423_v49, %v2332_v44 }
 0x2b3   : > { %2566 = vst.msk [vmem:[%s4170_s28 + $0x58] sm:$0xff] %vm2554_vm2, %v2513_v25 }
 0x2b4   : > { %v2337_v42 = vpop.f32.mrf.mxu3 }
 0x2b5   : > { %v2338_v35 = vadd.f32 %v2337_v42, %v2246_v6 }
 0x2b6   : > { %v2248_v39 = vpop.f32.mrf.mxu1 }
 0x2b7   : > { %v2249_v58 = vadd.f32 %v4143_v17, %v2248_v39 }
 0x2b8   : > { %v2515_v11 = vpop.f32.mrf.mxu2  ;;  %v2426_v22 = vpop.f32.mrf.mxu0 }
 0x2b9   : > { %v2516_v46 = vadd.f32 %v2515_v11, %v2424_v52  ;;  %v2427_v14 = vadd.f32 %v2426_v22, %v2335_v50 }
 0x2bb   : > { %2567 = vst.msk [vmem:[%s4170_s28 + $0x60] sm:$0xff] %vm2554_vm2, %v2516_v46 }
 0x2bc   : > { %v2340_v45 = vpop.f32.mrf.mxu3 }
 0x2bd   : > { %v2341_v15 = vadd.f32 %v2340_v45, %v2249_v58 }
 0x2be   : > { %v2251_v55 = vpop.f32.mrf.mxu1 }
 0x2bf   : > { %v2252_v53 = vadd.f32 %v4143_v17, %v2251_v55 }
 0x2c0   : > { %v2518_v51 = vpop.f32.mrf.mxu2  ;;  %v2429_v40 = vpop.f32.mrf.mxu0 }
 0x2c1   : > { %v2519_v9 = vadd.f32 %v2518_v51, %v2427_v14  ;;  %v2430_v19 = vadd.f32 %v2429_v40, %v2338_v35 }
 0x2c3   : > { %2568 = vst.msk [vmem:[%s4170_s28 + $0x68] sm:$0xff] %vm2554_vm2, %v2519_v9 }
 0x2c4   : > { %v2343_v12 = vpop.f32.mrf.mxu3 }
 0x2c5   : > { %v2344_v24 = vadd.f32 %v2343_v12, %v2252_v53 }
 0x2c6   : > { %v2254_v4 = vpop.f32.mrf.mxu1 }
 0x2c7   : > { %v2255_v5 = vadd.f32 %v4143_v17, %v2254_v4 }
 0x2c8   : > { %v2521_v27 = vpop.f32.mrf.mxu2  ;;  %v2432_v41 = vpop.f32.mrf.mxu0 }
 0x2c9   : > { %v2522_v8 = vadd.f32 %v2521_v27, %v2430_v19  ;;  %v2433_v38 = vadd.f32 %v2432_v41, %v2341_v15 }
 0x2cb   : > { %2569 = vst.msk [vmem:[%s4170_s28 + $0x70] sm:$0xff] %vm2554_vm2, %v2522_v8 }
 0x2cc   : > { %v2346_v47 = vpop.f32.mrf.mxu3 }
 0x2cd   : > { %v2347_v59 = vadd.f32 %v2346_v47, %v2255_v5 }
 0x2ce   : > { %v2257_v36 = vpop.f32.mrf.mxu1 }
 0x2cf   : > { %v2258_v1 = vadd.f32 %v4143_v17, %v2257_v36 }
 0x2d0   : > { %v2524_v28 = vpop.f32.mrf.mxu2  ;;  %v2435_v29 = vpop.f32.mrf.mxu0 }
 0x2d1   : > { %v2525_v61 = vadd.f32 %v2524_v28, %v2433_v38  ;;  %v2436_v18 = vadd.f32 %v2435_v29, %v2344_v24 }
 0x2d3   : > { %2570 = vst.msk [vmem:[%s4170_s28 + $0x78] sm:$0xff] %vm2554_vm2, %v2525_v61 }
 0x2d4   : > { %v2349_v48 = vpop.f32.mrf.mxu3 }
 0x2d5   : > { %v2350_v32 = vadd.f32 %v2349_v48, %v2258_v1 }
 0x2d6   : > { %v2260_v63 = vpop.f32.mrf.mxu1 }
 0x2d7   : > { %v2261_v16 = vadd.f32 %v4143_v17, %v2260_v63 }
 0x2d8   : > { %v2527_v0 = vpop.f32.mrf.mxu2  ;;  %v2438_v2 = vpop.f32.mrf.mxu0 }
 0x2d9   : > { %v2528_v30 = vadd.f32 %v2527_v0, %v2436_v18  ;;  %v2439_v56 = vadd.f32 %v2438_v2, %v2347_v59 }
 0x2db   : > { %2571 = vst.msk [vmem:[%s4170_s28 + $0x80] sm:$0xff] %vm2554_vm2, %v2528_v30 }
 0x2dc   : > { %v2352_v31 = vpop.f32.mrf.mxu3 }
 0x2dd   : > { %v2353_v34 = vadd.f32 %v2352_v31, %v2261_v16 }
 0x2de   : > { %v2263_v54 = vpop.f32.mrf.mxu1 }
 0x2df   : > { %v2264_v42 = vadd.f32 %v4143_v17, %v2263_v54 }
 0x2e0   : > { %v2530_v3 = vpop.f32.mrf.mxu2  ;;  %v2441_v7 = vpop.f32.mrf.mxu0 }
 0x2e1   : > { %v2531_v13 = vadd.f32 %v2530_v3, %v2439_v56  ;;  %v2442_v33 = vadd.f32 %v2441_v7, %v2350_v32 }
 0x2e3   : > { %2572 = vst.msk [vmem:[%s4170_s28 + $0x88] sm:$0xff] %vm2554_vm2, %v2531_v13 }
 0x2e4   : > { %v2355_v60 = vpop.f32.mrf.mxu3 }
 0x2e5   : > { %v2356_v39 = vadd.f32 %v2355_v60, %v2264_v42 }
 0x2e6   : > { %v2266_v21 = vpop.f32.mrf.mxu1 }
 0x2e7   : > { %v2267_v45 = vadd.f32 %v4143_v17, %v2266_v21 }
 0x2e8   : > { %v2533_v62 = vpop.f32.mrf.mxu2  ;;  %v2444_v43 = vpop.f32.mrf.mxu0 }
 0x2e9   : > { %v2534_v23 = vadd.f32 %v2533_v62, %v2442_v33  ;;  %v2445_v20 = vadd.f32 %v2444_v43, %v2353_v34 }
 0x2eb   : > { %2573 = vst.msk [vmem:[%s4170_s28 + $0x90] sm:$0xff] %vm2554_vm2, %v2534_v23 }
 0x2ec   : > { %v2358_v26 = vpop.f32.mrf.mxu3 }
 0x2ed   : > { %v2359_v55 = vadd.f32 %v2358_v26, %v2267_v45 }
 0x2ee   : > { %v2269_v37 = vpop.f32.mrf.mxu1 }
 0x2ef   : > { %v2270_v12 = vadd.f32 %v4143_v17, %v2269_v37 }
 0x2f0   : > { %v2536_v49 = vpop.f32.mrf.mxu2  ;;  %v2447_v25 = vpop.f32.mrf.mxu0 }
 0x2f1   : > { %v2537_v57 = vadd.f32 %v2536_v49, %v2445_v20  ;;  %v2448_v11 = vadd.f32 %v2447_v25, %v2356_v39 }
 0x2f3   : > { %2574 = vst.msk [vmem:[%s4170_s28 + $0x98] sm:$0xff] %vm2554_vm2, %v2537_v57 }
 0x2f4   : > { %v2361_v44 = vpop.f32.mrf.mxu3 }
 0x2f5   : > { %v2362_v4 = vadd.f32 %v2361_v44, %v2270_v12 }
 0x2f6   : > { %v2272_v52 = vpop.f32.mrf.mxu1 }
 0x2f7   : > { %v2273_v15 = vadd.f32 %v4143_v17, %v2272_v52 }
 0x2f8   : > { %v2539_v22 = vpop.f32.mrf.mxu2  ;;  %v2450_v46 = vpop.f32.mrf.mxu0 }
 0x2f9   : > { %v2540_v10 = vadd.f32 %v2539_v22, %v2448_v11  ;;  %v2451_v51 = vadd.f32 %v2450_v46, %v2359_v55 }
 0x2fb   : > { %2575 = vst.msk [vmem:[%s4170_s28 + $0xa0] sm:$0xff] %vm2554_vm2, %v2540_v10 }
 0x2fc   : > { %v2364_v50 = vpop.f32.mrf.mxu3 }
 0x2fd   : > { %v2365_v29 = vadd.f32 %v2364_v50, %v2273_v15 }
 0x2fe   : > { %v2275_v14 = vpop.f32.mrf.mxu1 }
 0x2ff   : > { %v2276_v19 = vadd.f32 %v4143_v17, %v2275_v14 }
 0x300   : > { %v2542_v40 = vpop.f32.mrf.mxu2  ;;  %v2453_v6 = vpop.f32.mrf.mxu0 }
 0x301   : > { %v2543_v9 = vadd.f32 %v2542_v40, %v2451_v51  ;;  %v2454_v41 = vadd.f32 %v2453_v6, %v2362_v4 }
 0x303   : > { %2576 = vst.msk [vmem:[%s4170_s28 + $0xa8] sm:$0xff] %vm2554_vm2, %v2543_v9 }
 0x304   : > { %v2367_v35 = vpop.f32.mrf.mxu3 }
 0x305   : > { %v2368_v27 = vadd.f32 %v2367_v35, %v2276_v19 }
 0x306   : > { %v2459_v8 = vpop.f32.mrf.mxu1 }
 0x307   : > { %v2460_v36 = vadd.f32 %v2459_v8, %v2368_v27 }
 0x308   : > { %v2545_v58 = vpop.f32.mrf.mxu2  ;;  %v2456_v28 = vpop.f32.mrf.mxu0 }
 0x309   : > { %v2546_v47 = vadd.f32 %v2545_v58, %v2454_v41  ;;  %v2457_v53 = vadd.f32 %v2456_v28, %v2365_v29 }
 0x30b   : > { %2577 = vst.msk [vmem:[%s4170_s28 + $0xb0] sm:$0xff] %vm2554_vm2, %v2546_v47 }
 0x30c   : > { %v2551_v38 = vpop.f32.mrf.mxu3 }
 0x30d   : > { %v2552_v61 = vadd.f32 %v2551_v38, %v2460_v36 }
 0x30f   : > { %2580 = vst.msk [vmem:[%s4170_s28 + $0xc0] sm:$0xf] %vm2579_vm3, %v2552_v61 }
 0x310   : > { %v2548_v48 = vpop.f32.mrf.mxu2 }
 0x311   : > { %v2549_v24 = vadd.f32 %v2548_v48, %v2457_v53 }
 0x313   : > { %2578 = vst.msk [vmem:[%s4170_s28 + $0xb8] sm:$0xff] %vm2554_vm2, %v2549_v24 }
 0x314 PF: > { %s17_s24 = sadd.s32 1, %s2969_s24  }
 0x315   : > { %p14_p4 = scmp.ge.s32.totalorder %s17_s24, 4  }
 0x317   :  { %16 = sbr.rel (!%p14_p4) target bundleno = 1 (0x1), region = 84 }

</bundles_post_ra>
